<compile_context>
chip_gen: v6e
topology: v6e:2x2x1
jax: 0.10.0
libtpu: 0.0.40
codegen_flags: <defaults>
</compile_context>

<pallas_src>
import functools

import jax
import jax.numpy as jnp
from jax import lax
from jax.experimental import pallas as pl
from jax.experimental.pallas import tpu as pltpu


def _round_up(x, m):
    return (x + m - 1) // m * m


def _simplebot_kernel(idx_ref, emb_ref, w_ih_ref, w_hh_ref, b_gates_ref,
                      b_hn_ref, w_fc_ref, b_fc_ref, out_ref,
                      x_buf, gates_buf, *scratch,
                      table_in_vmem, unroll):
    """GRU forward for one sequence (batch = 1).

    Packed/padded layout (built by the wrapper):
      w_ih_ref : (E,  3*Hp)   gate order (r, z, n), each gate Hp lanes wide
      w_hh_ref : (Hp, 3*Hp)
      b_gates  : (1,  3*Hp)   = [b_ir+b_hr, b_iz+b_hz, b_in]   (folded r/z bias)
      b_hn     : (1,  Hp)     recurrent bias of the n gate (stays inside r*(...))
      w_fc_ref : (Hp, Op), b_fc_ref: (1, Op), out_ref: (1, Op)  (lane-dense)
    """
    seq_len = idx_ref.shape[0]
    vocab_size = emb_ref.shape[0]
    hp = w_hh_ref.shape[0]                      # padded hidden (multiple of 128)

    # ---- 1) Gather the `seq` embedding rows ---------------------------------
    if table_in_vmem:
        # Whole table arrived in VMEM via one coalesced BlockSpec DMA;
        # row gather is a cheap in-VMEM dynamic slice per token.
        for t in range(seq_len):
            tok = jnp.clip(idx_ref[t], 0, vocab_size - 1)   # guard OOB token ids
            x_buf[pl.ds(t, 1), :] = emb_ref[pl.ds(tok, 1), :]
    else:
        # Large-vocab path: table stays in HBM; per-row DMAs all target ONE
        # DMA semaphore, and the identical descriptors are reused for wait.
        copy_sem = scratch[0]
        copies = []
        for t in range(seq_len):
            tok = jnp.clip(idx_ref[t], 0, vocab_size - 1)
            cp = pltpu.make_async_copy(
                emb_ref.at[pl.ds(tok, 1)], x_buf.at[pl.ds(t, 1)], copy_sem)
            cp.start()
            copies.append(cp)
        for cp in copies:
            cp.wait()

    # ---- 2) Input projection hoisted out of the recurrence ------------------
    # One (seq, E) @ (E, 3Hp) matmul; b_hr / b_hz are already folded into
    # b_gates so the r/z bias add never appears on the serial chain.
    gates_buf[...] = (
        jnp.dot(x_buf[...], w_ih_ref[...], preferred_element_type=jnp.float32)
        + b_gates_ref[...]
    )

    # ---- 3) Serial GRU recurrence (bounded unroll) ---------------------------
    h0 = jnp.zeros((1, hp), jnp.float32)

    def step(t, h):
        ig = gates_buf[pl.ds(t, 1), :]                               # (1, 3Hp)
        hg = jnp.dot(h, w_hh_ref[...],
                     preferred_element_type=jnp.float32)             # (1, 3Hp)
        # One wide sigmoid for r and z (single EUP push), lane-aligned slices.
        rz = jax.nn.sigmoid(ig[:, : 2 * hp] + hg[:, : 2 * hp])       # (1, 2Hp)
        r = rz[:, :hp]
        z = rz[:, hp:]
        # PyTorch GRU: n = tanh(W_in x + b_in + r * (W_hn h + b_hn))
        n = jnp.tanh(ig[:, 2 * hp:] + r * (hg[:, 2 * hp:] + b_hn_ref[...]))
        # (1-z)*n + z*h == n + z*(h-n): one mul + one add on the serial chain.
        return n + z * (h - n)

    h_final = lax.fori_loop(0, seq_len, step, h0, unroll=unroll)     # (1, Hp)

    # ---- 4) fc(hidden.squeeze(0)) -> lane-dense (1, Op) store ---------------
    out_ref[...] = (
        jnp.dot(h_final, w_fc_ref[...], preferred_element_type=jnp.float32)
        + b_fc_ref[...]
    )


def simplebot_forward(token_ids, emb, w_ih, w_hh, b_ih, b_hh, w_fc, b_fc,
                      *, vmem_table_max_bytes=4 * 1024 * 1024, unroll=8):
    """Runs the SimpleBot forward pass.

    Weights are in PyTorch layout:
      emb  : (V, E)
      w_ih : (3H, E), w_hh : (3H, H), b_ih/b_hh : (3H,)   gate order (r, z, n)
      w_fc : (O, H),  b_fc : (O,)
    Returns (1, O) — prediction = fc(hidden.squeeze(0)), batch = 1.
    """
    token_ids = token_ids.astype(jnp.int32)
    seq_len = token_ids.shape[0]
    vocab_size, embedding_dim = emb.shape
    hidden_dim = w_hh.shape[1]
    out_dim = w_fc.shape[0]

    hp = _round_up(hidden_dim, 128)           # lane-aligned per-gate width
    op = _round_up(out_dim, 128)              # lane-dense fc output

    f32 = jnp.float32
    emb = emb.astype(f32)

    # ---- Pack / pad weights (layout plumbing outside the kernel) ------------
    w_ih_p = jnp.zeros((embedding_dim, 3 * hp), f32)
    w_hh_p = jnp.zeros((hp, 3 * hp), f32)
    b_gates = jnp.zeros((1, 3 * hp), f32)
    for k in range(3):
        w_ih_p = w_ih_p.at[:, k * hp:k * hp + hidden_dim].set(
            w_ih[k * hidden_dim:(k + 1) * hidden_dim, :].astype(f32).T)
        w_hh_p = w_hh_p.at[:hidden_dim, k * hp:k * hp + hidden_dim].set(
            w_hh[k * hidden_dim:(k + 1) * hidden_dim, :].astype(f32).T)
        bg = b_ih[k * hidden_dim:(k + 1) * hidden_dim].astype(f32)
        if k < 2:  # fold recurrent r/z biases into the hoisted projection
            bg = bg + b_hh[k * hidden_dim:(k + 1) * hidden_dim].astype(f32)
        b_gates = b_gates.at[0, k * hp:k * hp + hidden_dim].set(bg)
    b_hn = jnp.zeros((1, hp), f32).at[0, :hidden_dim].set(
        b_hh[2 * hidden_dim:3 * hidden_dim].astype(f32))
    w_fc_p = jnp.zeros((hp, op), f32).at[:hidden_dim, :out_dim].set(
        w_fc.astype(f32).T)
    b_fc_p = jnp.zeros((1, op), f32).at[0, :out_dim].set(b_fc.astype(f32))

    table_bytes = vocab_size * embedding_dim * 4
    table_in_vmem = table_bytes <= vmem_table_max_bytes

    # ---- VMEM budget (explicit for v7x's 64 MiB physical / 32 MiB scoped) ---
    resident_bytes = 4 * (
        w_ih_p.size + w_hh_p.size + b_gates.size + b_hn.size
        + w_fc_p.size + b_fc_p.size + op                      # out
        + seq_len * embedding_dim + seq_len * 3 * hp          # x_buf, gates_buf
        + (vocab_size * embedding_dim if table_in_vmem else 0))
    vmem_limit = int(min(max(2 * resident_bytes + (1 << 20), 4 << 20), 96 << 20))

    vmem = pl.BlockSpec(memory_space=pltpu.MemorySpace.VMEM)
    emb_spec = vmem if table_in_vmem else pl.BlockSpec(memory_space=pl.ANY)

    scratch_shapes = [
        pltpu.VMEM((seq_len, embedding_dim), f32),   # gathered embedding rows
        pltpu.VMEM((seq_len, 3 * hp), f32),          # hoisted input-proj gates
    ]
    if not table_in_vmem:
        scratch_shapes.append(pltpu.SemaphoreType.DMA)   # single shared DMA sem

    kernel = functools.partial(
        _simplebot_kernel,
        table_in_vmem=table_in_vmem,
        unroll=min(unroll, seq_len),
    )

    out_padded = pl.pallas_call(
        kernel,
        out_shape=jax.ShapeDtypeStruct((1, op), f32),
        in_specs=[
            pl.BlockSpec(memory_space=pltpu.MemorySpace.SMEM),   # token ids
            emb_spec,                                            # embedding table
            vmem, vmem, vmem, vmem, vmem, vmem,
        ],
        out_specs=pl.BlockSpec(memory_space=pltpu.MemorySpace.VMEM),
        scratch_shapes=scratch_shapes,
        compiler_params=pltpu.CompilerParams(vmem_limit_bytes=vmem_limit),
    )(token_ids, emb, w_ih_p, w_hh_p, b_gates, b_hn, w_fc_p, b_fc_p)

    return out_padded[:, :out_dim]


def simplebot_reference(token_ids, emb, w_ih, w_hh, b_ih, b_hh, w_fc, b_fc):
    """Pure-JAX reference with PyTorch GRU semantics (gate order r, z, n)."""
    hidden_dim = w_hh.shape[1]
    x = emb[token_ids]                                      # (seq, E)
    h = jnp.zeros((hidden_dim,), jnp.float32)
    for t in range(x.shape[0]):
        gi = w_ih @ x[t] + b_ih                             # (3H,)
        gh = w_hh @ h + b_hh                                # (3H,)
        r = jax.nn.sigmoid(gi[:hidden_dim] + gh[:hidden_dim])
        z = jax.nn.sigmoid(gi[hidden_dim:2 * hidden_dim]
                           + gh[hidden_dim:2 * hidden_dim])
        n = jnp.tanh(gi[2 * hidden_dim:] + r * gh[2 * hidden_dim:])
        h = (1.0 - z) * n + z * h
    return (w_fc @ h + b_fc)[None, :]                       # (1, O)


if __name__ == "__main__":
    # Small shapes consistent with SimpleBot(vocab_size, embedding_dim, hidden_dim, output_dim)
    vocab_size, embedding_dim, hidden_dim, output_dim = 32, 32, 32, 1
    seq_len = 8

    key = jax.random.PRNGKey(0)
    ks = jax.random.split(key, 8)

    emb = 0.1 * jax.random.normal(ks[0], (vocab_size, embedding_dim), jnp.float32)
    # PyTorch-layout GRU / Linear weights, gate order (r, z, n).
    w_ih = 0.1 * jax.random.normal(ks[1], (3 * hidden_dim, embedding_dim), jnp.float32)
    w_hh = 0.1 * jax.random.normal(ks[2], (3 * hidden_dim, hidden_dim), jnp.float32)
    b_ih = 0.1 * jax.random.normal(ks[3], (3 * hidden_dim,), jnp.float32)
    b_hh = 0.1 * jax.random.normal(ks[4], (3 * hidden_dim,), jnp.float32)
    w_fc = 0.1 * jax.random.normal(ks[5], (output_dim, hidden_dim), jnp.float32)
    b_fc = 0.1 * jax.random.normal(ks[6], (output_dim,), jnp.float32)

    token_ids = jax.random.randint(ks[7], (seq_len,), 0, vocab_size, dtype=jnp.int32)

    ref = simplebot_reference(token_ids, emb, w_ih, w_hh, b_ih, b_hh, w_fc, b_fc)

    # Path A: small table -> whole embedding table in VMEM (coalesced gather).
    out_vmem = simplebot_forward(token_ids, emb, w_ih, w_hh, b_ih, b_hh, w_fc, b_fc)
    out_vmem = jax.block_until_ready(out_vmem)
    assert out_vmem.shape == (1, output_dim)
    assert jnp.allclose(out_vmem, ref, atol=1e-4, rtol=1e-4), (out_vmem, ref)

    # Path B: force the large-vocab path (HBM table + single-semaphore DMA gather).
    out_hbm = simplebot_forward(token_ids, emb, w_ih, w_hh, b_ih, b_hh, w_fc, b_fc,
                                vmem_table_max_bytes=0)
    out_hbm = jax.block_until_ready(out_hbm)
    assert out_hbm.shape == (1, output_dim)
    assert jnp.allclose(out_hbm, ref, atol=1e-4, rtol=1e-4), (out_hbm, ref)

    print("KERNEL_OK")
</pallas_src>

<mosaic_0001>
module attributes {stable_mosaic.version = 11 : i64} {
  func.func @_simplebot_kernel(%arg0: memref<8xi32, #tpu.memory_space<smem>>, %arg1: memref<32x32xf32, #tpu.memory_space<vmem>>, %arg2: memref<32x384xf32, #tpu.memory_space<vmem>>, %arg3: memref<128x384xf32, #tpu.memory_space<vmem>>, %arg4: memref<1x384xf32, #tpu.memory_space<vmem>>, %arg5: memref<1x128xf32, #tpu.memory_space<vmem>>, %arg6: memref<128x128xf32, #tpu.memory_space<vmem>>, %arg7: memref<1x128xf32, #tpu.memory_space<vmem>>, %arg8: memref<1x128xf32, #tpu.memory_space<vmem>>, %arg9: memref<8x32xf32, #tpu.memory_space<vmem>>, %arg10: memref<8x384xf32, #tpu.memory_space<vmem>>) attributes {dimension_semantics = [], scalar_prefetch = 0 : i64, scratch_operands = 2 : i64, tpu.core_type = #tpu.core_type<tc>} {
    %c0 = arith.constant 0 : index
    %0 = memref.load %arg0[%c0] : memref<8xi32, #tpu.memory_space<smem>>
    %c0_i32 = arith.constant 0 : i32
    %c31_i32 = arith.constant 31 : i32
    %1 = arith.maxsi %c0_i32, %0 : i32
    %2 = arith.minsi %c31_i32, %1 : i32
    %3 = arith.index_cast %2 : i32 to index
    %c0_0 = arith.constant 0 : index
    %4 = vector.load %arg1[%3, %c0_0] : memref<32x32xf32, #tpu.memory_space<vmem>>, vector<1x32xf32>
    %c0_1 = arith.constant 0 : index
    %c0_2 = arith.constant 0 : index
    %5 = vector.load %arg9[%c0_1, %c0_2] : memref<8x32xf32, #tpu.memory_space<vmem>>, vector<1x32xf32>
    tpu.vector_store %arg9[%c0_1, %c0_2], %4 {strides = array<i32>} : memref<8x32xf32, #tpu.memory_space<vmem>>, vector<1x32xf32>,
    %c1 = arith.constant 1 : index
    %6 = memref.load %arg0[%c1] : memref<8xi32, #tpu.memory_space<smem>>
    %c0_i32_3 = arith.constant 0 : i32
    %c31_i32_4 = arith.constant 31 : i32
    %7 = arith.maxsi %c0_i32_3, %6 : i32
    %8 = arith.minsi %c31_i32_4, %7 : i32
    %9 = arith.index_cast %8 : i32 to index
    %c0_5 = arith.constant 0 : index
    %10 = vector.load %arg1[%9, %c0_5] : memref<32x32xf32, #tpu.memory_space<vmem>>, vector<1x32xf32>
    %c1_6 = arith.constant 1 : index
    %c0_7 = arith.constant 0 : index
    %11 = vector.load %arg9[%c1_6, %c0_7] : memref<8x32xf32, #tpu.memory_space<vmem>>, vector<1x32xf32>
    tpu.vector_store %arg9[%c1_6, %c0_7], %10 {strides = array<i32>} : memref<8x32xf32, #tpu.memory_space<vmem>>, vector<1x32xf32>,
    %c2 = arith.constant 2 : index
    %12 = memref.load %arg0[%c2] : memref<8xi32, #tpu.memory_space<smem>>
    %c0_i32_8 = arith.constant 0 : i32
    %c31_i32_9 = arith.constant 31 : i32
    %13 = arith.maxsi %c0_i32_8, %12 : i32
    %14 = arith.minsi %c31_i32_9, %13 : i32
    %15 = arith.index_cast %14 : i32 to index
    %c0_10 = arith.constant 0 : index
    %16 = vector.load %arg1[%15, %c0_10] : memref<32x32xf32, #tpu.memory_space<vmem>>, vector<1x32xf32>
    %c2_11 = arith.constant 2 : index
    %c0_12 = arith.constant 0 : index
    %17 = vector.load %arg9[%c2_11, %c0_12] : memref<8x32xf32, #tpu.memory_space<vmem>>, vector<1x32xf32>
    tpu.vector_store %arg9[%c2_11, %c0_12], %16 {strides = array<i32>} : memref<8x32xf32, #tpu.memory_space<vmem>>, vector<1x32xf32>,
    %c3 = arith.constant 3 : index
    %18 = memref.load %arg0[%c3] : memref<8xi32, #tpu.memory_space<smem>>
    %c0_i32_13 = arith.constant 0 : i32
    %c31_i32_14 = arith.constant 31 : i32
    %19 = arith.maxsi %c0_i32_13, %18 : i32
    %20 = arith.minsi %c31_i32_14, %19 : i32
    %21 = arith.index_cast %20 : i32 to index
    %c0_15 = arith.constant 0 : index
    %22 = vector.load %arg1[%21, %c0_15] : memref<32x32xf32, #tpu.memory_space<vmem>>, vector<1x32xf32>
    %c3_16 = arith.constant 3 : index
    %c0_17 = arith.constant 0 : index
    %23 = vector.load %arg9[%c3_16, %c0_17] : memref<8x32xf32, #tpu.memory_space<vmem>>, vector<1x32xf32>
    tpu.vector_store %arg9[%c3_16, %c0_17], %22 {strides = array<i32>} : memref<8x32xf32, #tpu.memory_space<vmem>>, vector<1x32xf32>,
    %c4 = arith.constant 4 : index
    %24 = memref.load %arg0[%c4] : memref<8xi32, #tpu.memory_space<smem>>
    %c0_i32_18 = arith.constant 0 : i32
    %c31_i32_19 = arith.constant 31 : i32
    %25 = arith.maxsi %c0_i32_18, %24 : i32
    %26 = arith.minsi %c31_i32_19, %25 : i32
    %27 = arith.index_cast %26 : i32 to index
    %c0_20 = arith.constant 0 : index
    %28 = vector.load %arg1[%27, %c0_20] : memref<32x32xf32, #tpu.memory_space<vmem>>, vector<1x32xf32>
    %c4_21 = arith.constant 4 : index
    %c0_22 = arith.constant 0 : index
    %29 = vector.load %arg9[%c4_21, %c0_22] : memref<8x32xf32, #tpu.memory_space<vmem>>, vector<1x32xf32>
    tpu.vector_store %arg9[%c4_21, %c0_22], %28 {strides = array<i32>} : memref<8x32xf32, #tpu.memory_space<vmem>>, vector<1x32xf32>,
    %c5 = arith.constant 5 : index
    %30 = memref.load %arg0[%c5] : memref<8xi32, #tpu.memory_space<smem>>
    %c0_i32_23 = arith.constant 0 : i32
    %c31_i32_24 = arith.constant 31 : i32
    %31 = arith.maxsi %c0_i32_23, %30 : i32
    %32 = arith.minsi %c31_i32_24, %31 : i32
    %33 = arith.index_cast %32 : i32 to index
    %c0_25 = arith.constant 0 : index
    %34 = vector.load %arg1[%33, %c0_25] : memref<32x32xf32, #tpu.memory_space<vmem>>, vector<1x32xf32>
    %c5_26 = arith.constant 5 : index
    %c0_27 = arith.constant 0 : index
    %35 = vector.load %arg9[%c5_26, %c0_27] : memref<8x32xf32, #tpu.memory_space<vmem>>, vector<1x32xf32>
    tpu.vector_store %arg9[%c5_26, %c0_27], %34 {strides = array<i32>} : memref<8x32xf32, #tpu.memory_space<vmem>>, vector<1x32xf32>,
    %c6 = arith.constant 6 : index
    %36 = memref.load %arg0[%c6] : memref<8xi32, #tpu.memory_space<smem>>
    %c0_i32_28 = arith.constant 0 : i32
    %c31_i32_29 = arith.constant 31 : i32
    %37 = arith.maxsi %c0_i32_28, %36 : i32
    %38 = arith.minsi %c31_i32_29, %37 : i32
    %39 = arith.index_cast %38 : i32 to index
    %c0_30 = arith.constant 0 : index
    %40 = vector.load %arg1[%39, %c0_30] : memref<32x32xf32, #tpu.memory_space<vmem>>, vector<1x32xf32>
    %c6_31 = arith.constant 6 : index
    %c0_32 = arith.constant 0 : index
    %41 = vector.load %arg9[%c6_31, %c0_32] : memref<8x32xf32, #tpu.memory_space<vmem>>, vector<1x32xf32>
    tpu.vector_store %arg9[%c6_31, %c0_32], %40 {strides = array<i32>} : memref<8x32xf32, #tpu.memory_space<vmem>>, vector<1x32xf32>,
    %c7 = arith.constant 7 : index
    %42 = memref.load %arg0[%c7] : memref<8xi32, #tpu.memory_space<smem>>
    %c0_i32_33 = arith.constant 0 : i32
    %c31_i32_34 = arith.constant 31 : i32
    %43 = arith.maxsi %c0_i32_33, %42 : i32
    %44 = arith.minsi %c31_i32_34, %43 : i32
    %45 = arith.index_cast %44 : i32 to index
    %c0_35 = arith.constant 0 : index
    %46 = vector.load %arg1[%45, %c0_35] : memref<32x32xf32, #tpu.memory_space<vmem>>, vector<1x32xf32>
    %c7_36 = arith.constant 7 : index
    %c0_37 = arith.constant 0 : index
    %47 = vector.load %arg9[%c7_36, %c0_37] : memref<8x32xf32, #tpu.memory_space<vmem>>, vector<1x32xf32>
    tpu.vector_store %arg9[%c7_36, %c0_37], %46 {strides = array<i32>} : memref<8x32xf32, #tpu.memory_space<vmem>>, vector<1x32xf32>,
    %c0_38 = arith.constant 0 : index
    %c0_39 = arith.constant 0 : index
    %48 = vector.load %arg9[%c0_38, %c0_39] : memref<8x32xf32, #tpu.memory_space<vmem>>, vector<8x32xf32>
    %c0_40 = arith.constant 0 : index
    %c0_41 = arith.constant 0 : index
    %49 = vector.load %arg2[%c0_40, %c0_41] : memref<32x384xf32, #tpu.memory_space<vmem>>, vector<32x384xf32>
    %cst = arith.constant dense<0.000000e+00> : vector<8x384xf32>
    %50 = tpu.matmul %48, %49, %cst {dimension_numbers = #tpu.dot_dimension_numbers<[1], [0], [0], [1], [0, 0, 1, 1], [], []>} : vector<8x32xf32>, vector<32x384xf32>, vector<8x384xf32> -> vector<8x384xf32>
    %c0_42 = arith.constant 0 : index
    %c0_43 = arith.constant 0 : index
    %51 = vector.load %arg4[%c0_42, %c0_43] : memref<1x384xf32, #tpu.memory_space<vmem>>, vector<1x384xf32>
    %52 = vector.broadcast %51 : vector<1x384xf32> to vector<8x384xf32>
    %53 = arith.addf %50, %52 : vector<8x384xf32>
    %c0_44 = arith.constant 0 : index
    %c0_45 = arith.constant 0 : index
    %54 = vector.load %arg10[%c0_44, %c0_45] : memref<8x384xf32, #tpu.memory_space<vmem>>, vector<8x384xf32>
    tpu.vector_store %arg10[%c0_44, %c0_45], %53 {strides = array<i32>} : memref<8x384xf32, #tpu.memory_space<vmem>>, vector<8x384xf32>,
    %cst_46 = arith.constant 0.000000e+00 : f32
    %55 = vector.broadcast %cst_46 : f32 to vector<1x128xf32>
    %c0_i32_47 = arith.constant 0 : i32
    %56 = arith.index_cast %c0_i32_47 : i32 to index
    %c0_48 = arith.constant 0 : index
    %57 = vector.load %arg10[%56, %c0_48] : memref<8x384xf32, #tpu.memory_space<vmem>>, vector<1x384xf32>
    %c0_49 = arith.constant 0 : index
    %c0_50 = arith.constant 0 : index
    %58 = vector.load %arg3[%c0_49, %c0_50] : memref<128x384xf32, #tpu.memory_space<vmem>>, vector<128x384xf32>
    %cst_51 = arith.constant dense<0.000000e+00> : vector<1x384xf32>
    %59 = tpu.matmul %55, %58, %cst_51 {dimension_numbers = #tpu.dot_dimension_numbers<[1], [0], [0], [1], [0, 0, 1, 1], [], []>} : vector<1x128xf32>, vector<128x384xf32>, vector<1x384xf32> -> vector<1x384xf32>
    %60 = vector.extract_strided_slice %57 {offsets = [0, 0], sizes = [1, 256], strides = [1, 1]} : vector<1x384xf32> to vector<1x256xf32>
    %61 = vector.extract_strided_slice %59 {offsets = [0, 0], sizes = [1, 256], strides = [1, 1]} : vector<1x384xf32> to vector<1x256xf32>
    %62 = arith.addf %60, %61 : vector<1x256xf32>
    %63 = arith.negf %62 : vector<1x256xf32>
    %64 = math.exp %63 : vector<1x256xf32>
    %cst_52 = arith.constant 1.000000e+00 : f32
    %65 = vector.broadcast %cst_52 : f32 to vector<1x256xf32>
    %66 = arith.addf %65, %64 : vector<1x256xf32>
    %67 = arith.divf %65, %66 : vector<1x256xf32>
    %68 = vector.extract_strided_slice %67 {offsets = [0, 0], sizes = [1, 128], strides = [1, 1]} : vector<1x256xf32> to vector<1x128xf32>
    %69 = vector.extract_strided_slice %67 {offsets = [0, 128], sizes = [1, 128], strides = [1, 1]} : vector<1x256xf32> to vector<1x128xf32>
    %70 = vector.extract_strided_slice %57 {offsets = [0, 256], sizes = [1, 128], strides = [1, 1]} : vector<1x384xf32> to vector<1x128xf32>
    %71 = vector.extract_strided_slice %59 {offsets = [0, 256], sizes = [1, 128], strides = [1, 1]} : vector<1x384xf32> to vector<1x128xf32>
    %c0_53 = arith.constant 0 : index
    %c0_54 = arith.constant 0 : index
    %72 = vector.load %arg5[%c0_53, %c0_54] : memref<1x128xf32, #tpu.memory_space<vmem>>, vector<1x128xf32>
    %73 = arith.addf %71, %72 : vector<1x128xf32>
    %74 = arith.mulf %68, %73 : vector<1x128xf32>
    %75 = arith.addf %70, %74 : vector<1x128xf32>
    %76 = math.tanh %75 : vector<1x128xf32>
    %77 = arith.subf %55, %76 : vector<1x128xf32>
    %78 = arith.mulf %69, %77 : vector<1x128xf32>
    %79 = arith.addf %76, %78 : vector<1x128xf32>
    %c1_i32 = arith.constant 1 : i32
    %80 = arith.index_cast %c1_i32 : i32 to index
    %c0_55 = arith.constant 0 : index
    %81 = vector.load %arg10[%80, %c0_55] : memref<8x384xf32, #tpu.memory_space<vmem>>, vector<1x384xf32>
    %c0_56 = arith.constant 0 : index
    %c0_57 = arith.constant 0 : index
    %82 = vector.load %arg3[%c0_56, %c0_57] : memref<128x384xf32, #tpu.memory_space<vmem>>, vector<128x384xf32>
    %cst_58 = arith.constant dense<0.000000e+00> : vector<1x384xf32>
    %83 = tpu.matmul %79, %82, %cst_58 {dimension_numbers = #tpu.dot_dimension_numbers<[1], [0], [0], [1], [0, 0, 1, 1], [], []>} : vector<1x128xf32>, vector<128x384xf32>, vector<1x384xf32> -> vector<1x384xf32>
    %84 = vector.extract_strided_slice %81 {offsets = [0, 0], sizes = [1, 256], strides = [1, 1]} : vector<1x384xf32> to vector<1x256xf32>
    %85 = vector.extract_strided_slice %83 {offsets = [0, 0], sizes = [1, 256], strides = [1, 1]} : vector<1x384xf32> to vector<1x256xf32>
    %86 = arith.addf %84, %85 : vector<1x256xf32>
    %87 = arith.negf %86 : vector<1x256xf32>
    %88 = math.exp %87 : vector<1x256xf32>
    %cst_59 = arith.constant 1.000000e+00 : f32
    %89 = vector.broadcast %cst_59 : f32 to vector<1x256xf32>
    %90 = arith.addf %89, %88 : vector<1x256xf32>
    %91 = arith.divf %89, %90 : vector<1x256xf32>
    %92 = vector.extract_strided_slice %91 {offsets = [0, 0], sizes = [1, 128], strides = [1, 1]} : vector<1x256xf32> to vector<1x128xf32>
    %93 = vector.extract_strided_slice %91 {offsets = [0, 128], sizes = [1, 128], strides = [1, 1]} : vector<1x256xf32> to vector<1x128xf32>
    %94 = vector.extract_strided_slice %81 {offsets = [0, 256], sizes = [1, 128], strides = [1, 1]} : vector<1x384xf32> to vector<1x128xf32>
    %95 = vector.extract_strided_slice %83 {offsets = [0, 256], sizes = [1, 128], strides = [1, 1]} : vector<1x384xf32> to vector<1x128xf32>
    %c0_60 = arith.constant 0 : index
    %c0_61 = arith.constant 0 : index
    %96 = vector.load %arg5[%c0_60, %c0_61] : memref<1x128xf32, #tpu.memory_space<vmem>>, vector<1x128xf32>
    %97 = arith.addf %95, %96 : vector<1x128xf32>
    %98 = arith.mulf %92, %97 : vector<1x128xf32>
    %99 = arith.addf %94, %98 : vector<1x128xf32>
    %100 = math.tanh %99 : vector<1x128xf32>
    %101 = arith.subf %79, %100 : vector<1x128xf32>
    %102 = arith.mulf %93, %101 : vector<1x128xf32>
    %103 = arith.addf %100, %102 : vector<1x128xf32>
    %c2_i32 = arith.constant 2 : i32
    %104 = arith.index_cast %c2_i32 : i32 to index
    %c0_62 = arith.constant 0 : index
    %105 = vector.load %arg10[%104, %c0_62] : memref<8x384xf32, #tpu.memory_space<vmem>>, vector<1x384xf32>
    %c0_63 = arith.constant 0 : index
    %c0_64 = arith.constant 0 : index
    %106 = vector.load %arg3[%c0_63, %c0_64] : memref<128x384xf32, #tpu.memory_space<vmem>>, vector<128x384xf32>
    %cst_65 = arith.constant dense<0.000000e+00> : vector<1x384xf32>
    %107 = tpu.matmul %103, %106, %cst_65 {dimension_numbers = #tpu.dot_dimension_numbers<[1], [0], [0], [1], [0, 0, 1, 1], [], []>} : vector<1x128xf32>, vector<128x384xf32>, vector<1x384xf32> -> vector<1x384xf32>
    %108 = vector.extract_strided_slice %105 {offsets = [0, 0], sizes = [1, 256], strides = [1, 1]} : vector<1x384xf32> to vector<1x256xf32>
    %109 = vector.extract_strided_slice %107 {offsets = [0, 0], sizes = [1, 256], strides = [1, 1]} : vector<1x384xf32> to vector<1x256xf32>
    %110 = arith.addf %108, %109 : vector<1x256xf32>
    %111 = arith.negf %110 : vector<1x256xf32>
    %112 = math.exp %111 : vector<1x256xf32>
    %cst_66 = arith.constant 1.000000e+00 : f32
    %113 = vector.broadcast %cst_66 : f32 to vector<1x256xf32>
    %114 = arith.addf %113, %112 : vector<1x256xf32>
    %115 = arith.divf %113, %114 : vector<1x256xf32>
    %116 = vector.extract_strided_slice %115 {offsets = [0, 0], sizes = [1, 128], strides = [1, 1]} : vector<1x256xf32> to vector<1x128xf32>
    %117 = vector.extract_strided_slice %115 {offsets = [0, 128], sizes = [1, 128], strides = [1, 1]} : vector<1x256xf32> to vector<1x128xf32>
    %118 = vector.extract_strided_slice %105 {offsets = [0, 256], sizes = [1, 128], strides = [1, 1]} : vector<1x384xf32> to vector<1x128xf32>
    %119 = vector.extract_strided_slice %107 {offsets = [0, 256], sizes = [1, 128], strides = [1, 1]} : vector<1x384xf32> to vector<1x128xf32>
    %c0_67 = arith.constant 0 : index
    %c0_68 = arith.constant 0 : index
    %120 = vector.load %arg5[%c0_67, %c0_68] : memref<1x128xf32, #tpu.memory_space<vmem>>, vector<1x128xf32>
    %121 = arith.addf %119, %120 : vector<1x128xf32>
    %122 = arith.mulf %116, %121 : vector<1x128xf32>
    %123 = arith.addf %118, %122 : vector<1x128xf32>
    %124 = math.tanh %123 : vector<1x128xf32>
    %125 = arith.subf %103, %124 : vector<1x128xf32>
    %126 = arith.mulf %117, %125 : vector<1x128xf32>
    %127 = arith.addf %124, %126 : vector<1x128xf32>
    %c3_i32 = arith.constant 3 : i32
    %128 = arith.index_cast %c3_i32 : i32 to index
    %c0_69 = arith.constant 0 : index
    %129 = vector.load %arg10[%128, %c0_69] : memref<8x384xf32, #tpu.memory_space<vmem>>, vector<1x384xf32>
    %c0_70 = arith.constant 0 : index
    %c0_71 = arith.constant 0 : index
    %130 = vector.load %arg3[%c0_70, %c0_71] : memref<128x384xf32, #tpu.memory_space<vmem>>, vector<128x384xf32>
    %cst_72 = arith.constant dense<0.000000e+00> : vector<1x384xf32>
    %131 = tpu.matmul %127, %130, %cst_72 {dimension_numbers = #tpu.dot_dimension_numbers<[1], [0], [0], [1], [0, 0, 1, 1], [], []>} : vector<1x128xf32>, vector<128x384xf32>, vector<1x384xf32> -> vector<1x384xf32>
    %132 = vector.extract_strided_slice %129 {offsets = [0, 0], sizes = [1, 256], strides = [1, 1]} : vector<1x384xf32> to vector<1x256xf32>
    %133 = vector.extract_strided_slice %131 {offsets = [0, 0], sizes = [1, 256], strides = [1, 1]} : vector<1x384xf32> to vector<1x256xf32>
    %134 = arith.addf %132, %133 : vector<1x256xf32>
    %135 = arith.negf %134 : vector<1x256xf32>
    %136 = math.exp %135 : vector<1x256xf32>
    %cst_73 = arith.constant 1.000000e+00 : f32
    %137 = vector.broadcast %cst_73 : f32 to vector<1x256xf32>
    %138 = arith.addf %137, %136 : vector<1x256xf32>
    %139 = arith.divf %137, %138 : vector<1x256xf32>
    %140 = vector.extract_strided_slice %139 {offsets = [0, 0], sizes = [1, 128], strides = [1, 1]} : vector<1x256xf32> to vector<1x128xf32>
    %141 = vector.extract_strided_slice %139 {offsets = [0, 128], sizes = [1, 128], strides = [1, 1]} : vector<1x256xf32> to vector<1x128xf32>
    %142 = vector.extract_strided_slice %129 {offsets = [0, 256], sizes = [1, 128], strides = [1, 1]} : vector<1x384xf32> to vector<1x128xf32>
    %143 = vector.extract_strided_slice %131 {offsets = [0, 256], sizes = [1, 128], strides = [1, 1]} : vector<1x384xf32> to vector<1x128xf32>
    %c0_74 = arith.constant 0 : index
    %c0_75 = arith.constant 0 : index
    %144 = vector.load %arg5[%c0_74, %c0_75] : memref<1x128xf32, #tpu.memory_space<vmem>>, vector<1x128xf32>
    %145 = arith.addf %143, %144 : vector<1x128xf32>
    %146 = arith.mulf %140, %145 : vector<1x128xf32>
    %147 = arith.addf %142, %146 : vector<1x128xf32>
    %148 = math.tanh %147 : vector<1x128xf32>
    %149 = arith.subf %127, %148 : vector<1x128xf32>
    %150 = arith.mulf %141, %149 : vector<1x128xf32>
    %151 = arith.addf %148, %150 : vector<1x128xf32>
    %c4_i32 = arith.constant 4 : i32
    %152 = arith.index_cast %c4_i32 : i32 to index
    %c0_76 = arith.constant 0 : index
    %153 = vector.load %arg10[%152, %c0_76] : memref<8x384xf32, #tpu.memory_space<vmem>>, vector<1x384xf32>
    %c0_77 = arith.constant 0 : index
    %c0_78 = arith.constant 0 : index
    %154 = vector.load %arg3[%c0_77, %c0_78] : memref<128x384xf32, #tpu.memory_space<vmem>>, vector<128x384xf32>
    %cst_79 = arith.constant dense<0.000000e+00> : vector<1x384xf32>
    %155 = tpu.matmul %151, %154, %cst_79 {dimension_numbers = #tpu.dot_dimension_numbers<[1], [0], [0], [1], [0, 0, 1, 1], [], []>} : vector<1x128xf32>, vector<128x384xf32>, vector<1x384xf32> -> vector<1x384xf32>
    %156 = vector.extract_strided_slice %153 {offsets = [0, 0], sizes = [1, 256], strides = [1, 1]} : vector<1x384xf32> to vector<1x256xf32>
    %157 = vector.extract_strided_slice %155 {offsets = [0, 0], sizes = [1, 256], strides = [1, 1]} : vector<1x384xf32> to vector<1x256xf32>
    %158 = arith.addf %156, %157 : vector<1x256xf32>
    %159 = arith.negf %158 : vector<1x256xf32>
    %160 = math.exp %159 : vector<1x256xf32>
    %cst_80 = arith.constant 1.000000e+00 : f32
    %161 = vector.broadcast %cst_80 : f32 to vector<1x256xf32>
    %162 = arith.addf %161, %160 : vector<1x256xf32>
    %163 = arith.divf %161, %162 : vector<1x256xf32>
    %164 = vector.extract_strided_slice %163 {offsets = [0, 0], sizes = [1, 128], strides = [1, 1]} : vector<1x256xf32> to vector<1x128xf32>
    %165 = vector.extract_strided_slice %163 {offsets = [0, 128], sizes = [1, 128], strides = [1, 1]} : vector<1x256xf32> to vector<1x128xf32>
    %166 = vector.extract_strided_slice %153 {offsets = [0, 256], sizes = [1, 128], strides = [1, 1]} : vector<1x384xf32> to vector<1x128xf32>
    %167 = vector.extract_strided_slice %155 {offsets = [0, 256], sizes = [1, 128], strides = [1, 1]} : vector<1x384xf32> to vector<1x128xf32>
    %c0_81 = arith.constant 0 : index
    %c0_82 = arith.constant 0 : index
    %168 = vector.load %arg5[%c0_81, %c0_82] : memref<1x128xf32, #tpu.memory_space<vmem>>, vector<1x128xf32>
    %169 = arith.addf %167, %168 : vector<1x128xf32>
    %170 = arith.mulf %164, %169 : vector<1x128xf32>
    %171 = arith.addf %166, %170 : vector<1x128xf32>
    %172 = math.tanh %171 : vector<1x128xf32>
    %173 = arith.subf %151, %172 : vector<1x128xf32>
    %174 = arith.mulf %165, %173 : vector<1x128xf32>
    %175 = arith.addf %172, %174 : vector<1x128xf32>
    %c5_i32 = arith.constant 5 : i32
    %176 = arith.index_cast %c5_i32 : i32 to index
    %c0_83 = arith.constant 0 : index
    %177 = vector.load %arg10[%176, %c0_83] : memref<8x384xf32, #tpu.memory_space<vmem>>, vector<1x384xf32>
    %c0_84 = arith.constant 0 : index
    %c0_85 = arith.constant 0 : index
    %178 = vector.load %arg3[%c0_84, %c0_85] : memref<128x384xf32, #tpu.memory_space<vmem>>, vector<128x384xf32>
    %cst_86 = arith.constant dense<0.000000e+00> : vector<1x384xf32>
    %179 = tpu.matmul %175, %178, %cst_86 {dimension_numbers = #tpu.dot_dimension_numbers<[1], [0], [0], [1], [0, 0, 1, 1], [], []>} : vector<1x128xf32>, vector<128x384xf32>, vector<1x384xf32> -> vector<1x384xf32>
    %180 = vector.extract_strided_slice %177 {offsets = [0, 0], sizes = [1, 256], strides = [1, 1]} : vector<1x384xf32> to vector<1x256xf32>
    %181 = vector.extract_strided_slice %179 {offsets = [0, 0], sizes = [1, 256], strides = [1, 1]} : vector<1x384xf32> to vector<1x256xf32>
    %182 = arith.addf %180, %181 : vector<1x256xf32>
    %183 = arith.negf %182 : vector<1x256xf32>
    %184 = math.exp %183 : vector<1x256xf32>
    %cst_87 = arith.constant 1.000000e+00 : f32
    %185 = vector.broadcast %cst_87 : f32 to vector<1x256xf32>
    %186 = arith.addf %185, %184 : vector<1x256xf32>
    %187 = arith.divf %185, %186 : vector<1x256xf32>
    %188 = vector.extract_strided_slice %187 {offsets = [0, 0], sizes = [1, 128], strides = [1, 1]} : vector<1x256xf32> to vector<1x128xf32>
    %189 = vector.extract_strided_slice %187 {offsets = [0, 128], sizes = [1, 128], strides = [1, 1]} : vector<1x256xf32> to vector<1x128xf32>
    %190 = vector.extract_strided_slice %177 {offsets = [0, 256], sizes = [1, 128], strides = [1, 1]} : vector<1x384xf32> to vector<1x128xf32>
    %191 = vector.extract_strided_slice %179 {offsets = [0, 256], sizes = [1, 128], strides = [1, 1]} : vector<1x384xf32> to vector<1x128xf32>
    %c0_88 = arith.constant 0 : index
    %c0_89 = arith.constant 0 : index
    %192 = vector.load %arg5[%c0_88, %c0_89] : memref<1x128xf32, #tpu.memory_space<vmem>>, vector<1x128xf32>
    %193 = arith.addf %191, %192 : vector<1x128xf32>
    %194 = arith.mulf %188, %193 : vector<1x128xf32>
    %195 = arith.addf %190, %194 : vector<1x128xf32>
    %196 = math.tanh %195 : vector<1x128xf32>
    %197 = arith.subf %175, %196 : vector<1x128xf32>
    %198 = arith.mulf %189, %197 : vector<1x128xf32>
    %199 = arith.addf %196, %198 : vector<1x128xf32>
    %c6_i32 = arith.constant 6 : i32
    %200 = arith.index_cast %c6_i32 : i32 to index
    %c0_90 = arith.constant 0 : index
    %201 = vector.load %arg10[%200, %c0_90] : memref<8x384xf32, #tpu.memory_space<vmem>>, vector<1x384xf32>
    %c0_91 = arith.constant 0 : index
    %c0_92 = arith.constant 0 : index
    %202 = vector.load %arg3[%c0_91, %c0_92] : memref<128x384xf32, #tpu.memory_space<vmem>>, vector<128x384xf32>
    %cst_93 = arith.constant dense<0.000000e+00> : vector<1x384xf32>
    %203 = tpu.matmul %199, %202, %cst_93 {dimension_numbers = #tpu.dot_dimension_numbers<[1], [0], [0], [1], [0, 0, 1, 1], [], []>} : vector<1x128xf32>, vector<128x384xf32>, vector<1x384xf32> -> vector<1x384xf32>
    %204 = vector.extract_strided_slice %201 {offsets = [0, 0], sizes = [1, 256], strides = [1, 1]} : vector<1x384xf32> to vector<1x256xf32>
    %205 = vector.extract_strided_slice %203 {offsets = [0, 0], sizes = [1, 256], strides = [1, 1]} : vector<1x384xf32> to vector<1x256xf32>
    %206 = arith.addf %204, %205 : vector<1x256xf32>
    %207 = arith.negf %206 : vector<1x256xf32>
    %208 = math.exp %207 : vector<1x256xf32>
    %cst_94 = arith.constant 1.000000e+00 : f32
    %209 = vector.broadcast %cst_94 : f32 to vector<1x256xf32>
    %210 = arith.addf %209, %208 : vector<1x256xf32>
    %211 = arith.divf %209, %210 : vector<1x256xf32>
    %212 = vector.extract_strided_slice %211 {offsets = [0, 0], sizes = [1, 128], strides = [1, 1]} : vector<1x256xf32> to vector<1x128xf32>
    %213 = vector.extract_strided_slice %211 {offsets = [0, 128], sizes = [1, 128], strides = [1, 1]} : vector<1x256xf32> to vector<1x128xf32>
    %214 = vector.extract_strided_slice %201 {offsets = [0, 256], sizes = [1, 128], strides = [1, 1]} : vector<1x384xf32> to vector<1x128xf32>
    %215 = vector.extract_strided_slice %203 {offsets = [0, 256], sizes = [1, 128], strides = [1, 1]} : vector<1x384xf32> to vector<1x128xf32>
    %c0_95 = arith.constant 0 : index
    %c0_96 = arith.constant 0 : index
    %216 = vector.load %arg5[%c0_95, %c0_96] : memref<1x128xf32, #tpu.memory_space<vmem>>, vector<1x128xf32>
    %217 = arith.addf %215, %216 : vector<1x128xf32>
    %218 = arith.mulf %212, %217 : vector<1x128xf32>
    %219 = arith.addf %214, %218 : vector<1x128xf32>
    %220 = math.tanh %219 : vector<1x128xf32>
    %221 = arith.subf %199, %220 : vector<1x128xf32>
    %222 = arith.mulf %213, %221 : vector<1x128xf32>
    %223 = arith.addf %220, %222 : vector<1x128xf32>
    %c7_i32 = arith.constant 7 : i32
    %224 = arith.index_cast %c7_i32 : i32 to index
    %c0_97 = arith.constant 0 : index
    %225 = vector.load %arg10[%224, %c0_97] : memref<8x384xf32, #tpu.memory_space<vmem>>, vector<1x384xf32>
    %c0_98 = arith.constant 0 : index
    %c0_99 = arith.constant 0 : index
    %226 = vector.load %arg3[%c0_98, %c0_99] : memref<128x384xf32, #tpu.memory_space<vmem>>, vector<128x384xf32>
    %cst_100 = arith.constant dense<0.000000e+00> : vector<1x384xf32>
    %227 = tpu.matmul %223, %226, %cst_100 {dimension_numbers = #tpu.dot_dimension_numbers<[1], [0], [0], [1], [0, 0, 1, 1], [], []>} : vector<1x128xf32>, vector<128x384xf32>, vector<1x384xf32> -> vector<1x384xf32>
    %228 = vector.extract_strided_slice %225 {offsets = [0, 0], sizes = [1, 256], strides = [1, 1]} : vector<1x384xf32> to vector<1x256xf32>
    %229 = vector.extract_strided_slice %227 {offsets = [0, 0], sizes = [1, 256], strides = [1, 1]} : vector<1x384xf32> to vector<1x256xf32>
    %230 = arith.addf %228, %229 : vector<1x256xf32>
    %231 = arith.negf %230 : vector<1x256xf32>
    %232 = math.exp %231 : vector<1x256xf32>
    %cst_101 = arith.constant 1.000000e+00 : f32
    %233 = vector.broadcast %cst_101 : f32 to vector<1x256xf32>
    %234 = arith.addf %233, %232 : vector<1x256xf32>
    %235 = arith.divf %233, %234 : vector<1x256xf32>
    %236 = vector.extract_strided_slice %235 {offsets = [0, 0], sizes = [1, 128], strides = [1, 1]} : vector<1x256xf32> to vector<1x128xf32>
    %237 = vector.extract_strided_slice %235 {offsets = [0, 128], sizes = [1, 128], strides = [1, 1]} : vector<1x256xf32> to vector<1x128xf32>
    %238 = vector.extract_strided_slice %225 {offsets = [0, 256], sizes = [1, 128], strides = [1, 1]} : vector<1x384xf32> to vector<1x128xf32>
    %239 = vector.extract_strided_slice %227 {offsets = [0, 256], sizes = [1, 128], strides = [1, 1]} : vector<1x384xf32> to vector<1x128xf32>
    %c0_102 = arith.constant 0 : index
    %c0_103 = arith.constant 0 : index
    %240 = vector.load %arg5[%c0_102, %c0_103] : memref<1x128xf32, #tpu.memory_space<vmem>>, vector<1x128xf32>
    %241 = arith.addf %239, %240 : vector<1x128xf32>
    %242 = arith.mulf %236, %241 : vector<1x128xf32>
    %243 = arith.addf %238, %242 : vector<1x128xf32>
    %244 = math.tanh %243 : vector<1x128xf32>
    %245 = arith.subf %223, %244 : vector<1x128xf32>
    %246 = arith.mulf %237, %245 : vector<1x128xf32>
    %247 = arith.addf %244, %246 : vector<1x128xf32>
    %c8_i32 = arith.constant 8 : i32
    %c0_104 = arith.constant 0 : index
    %c0_105 = arith.constant 0 : index
    %248 = vector.load %arg6[%c0_104, %c0_105] : memref<128x128xf32, #tpu.memory_space<vmem>>, vector<128x128xf32>
    %cst_106 = arith.constant dense<0.000000e+00> : vector<1x128xf32>
    %249 = tpu.matmul %247, %248, %cst_106 {dimension_numbers = #tpu.dot_dimension_numbers<[1], [0], [0], [1], [0, 0, 1, 1], [], []>} : vector<1x128xf32>, vector<128x128xf32>, vector<1x128xf32> -> vector<1x128xf32>
    %c0_107 = arith.constant 0 : index
    %c0_108 = arith.constant 0 : index
    %250 = vector.load %arg7[%c0_107, %c0_108] : memref<1x128xf32, #tpu.memory_space<vmem>>, vector<1x128xf32>
    %251 = arith.addf %249, %250 : vector<1x128xf32>
    %c0_109 = arith.constant 0 : index
    %c0_110 = arith.constant 0 : index
    %252 = vector.load %arg8[%c0_109, %c0_110] : memref<1x128xf32, #tpu.memory_space<vmem>>, vector<1x128xf32>
    tpu.vector_store %arg8[%c0_109, %c0_110], %251 {strides = array<i32>} : memref<1x128xf32, #tpu.memory_space<vmem>>, vector<1x128xf32>,
    return
  }
}

</mosaic_0001>

<bundles_post_ra>
// kernel: tpu_custom_call.1
= control target key start
LH: loop header
LB: loop body
LE: loop exit
PB: predicated region body
PF: predicated region fallthrough
CT: control target
= control target key end

     0   :  { %13 = vsyncpa [#allocation7], 0  ;;  %s3706_s0 = inlined_call_operand.hbm [shape: s32[8], index: 0, kind: input, shape index: {}]   ;;  %s3707_s1 = inlined_call_operand.hbm [shape: f32[32,32], index: 1, kind: input, shape index: {}]   ;;  %s3708_s2 = inlined_call_operand.hbm [shape: f32[32,384], index: 2, kind: input, shape index: {}]   ;;  %s3709_s3 = inlined_call_operand.hbm [shape: f32[128,384], index: 3, kind: input, shape index: {}]   ;;  %s3710_s4 = inlined_call_operand.vmem [shape: f32[1,384], index: 4, kind: input, shape index: {}]   ;;  %s3711_s5 = inlined_call_operand.vmem [shape: f32[1,128], index: 5, kind: input, shape index: {}]   ;;  %s3712_s6 = inlined_call_operand.hbm [shape: f32[128,128], index: 6, kind: input, shape index: {}]   ;;  %s3713_s7 = inlined_call_operand.vmem [shape: f32[1,128], index: 7, kind: input, shape index: {}]   ;;  %s3714_s8 = inlined_call_operand.hbm [shape: f32[1,128], index: 8, kind: output, shape index: {}]  }
   0x1   :  { %14 = vsyncpa [#allocation5], 0 }
   0x2   :  { %15 = vsyncpa [#allocation10], 0 }
   0x3   :  { %16 = vsyncpa [#allocation13], 0 }
   0x4   :  { %17 = vsyncpa [#allocation6], 0  ;;  %s2734_s27 = smov [#allocation9]  }
   0x5   :  { %s43_s28 = sshll.u32 %s2734_s27, 4  ;;  %s44_s28 = int_to_ptr.vmem [resolvable:$true] %s43_s28 }
   0x6   :  { %s2624_s29 = scalar_lea.vmem %s44_s28, 1536  ;;  %p2629_p1 = scmp.lt.s32.totalorder %s44_s28, %s44_s28 }
   0x7   :  { %p2625_p0 = scmp.ne.s32.totalorder %s44_s28, %s2624_s29  ;;  %p2630_p2 = scmp.lt.s32.totalorder %s2624_s29, %s2624_s29 }
   0x9   :  { %p2631_p3 = por %p2630_p2, %p2629_p1 }
   0xb   :  { %p2632_p4 = pnand %p2631_p3, %p2625_p0 }
   0xd   :  { %2635 = shalt.err (!%p2632_p4)
}
   0xe   :  { %s2735_s30 = smov 384   ;;  %s2736_s9 = smov 24  }
   0xf   :  { %49 = dma.hbm_to_vmem [thread:$0]  %s3708_s2, 1536, %s44_s28, [#allocation10], %s2735_s30, %s2735_s30, %s2736_s9  }
  0x10   :  { %s2737_s12 = smov [#allocation4]   ;;  %s2738_s15 = smov [#allocation8]  }
  0x11   :  { %25 = dma.hbm_to_smem %s3706_s0, 16, %s2737_s12, [#allocation7]  }
  0x12   :  { %s31_s16 = sshll.u32 %s2738_s15, 4  ;;  %s32_s16 = int_to_ptr.vmem [resolvable:$true] %s31_s16 }
  0x13   :  { %s2652_s17 = scalar_lea.vmem %s32_s16, 512  ;;  %p2657_p6 = scmp.lt.s32.totalorder %s32_s16, %s32_s16 }
  0x14   :  { %p2653_p5 = scmp.ne.s32.totalorder %s32_s16, %s2652_s17  ;;  %p2658_p7 = scmp.lt.s32.totalorder %s2652_s17, %s2652_s17 }
  0x16   :  { %p2659_p8 = por %p2658_p7, %p2657_p6 }
  0x18   :  { %p2660_p9 = pnand %p2659_p8, %p2653_p5 }
  0x1a   :  { %2663 = shalt.err (!%p2660_p9)
}
  0x1b   :  { %s2739_s18 = smov 128   ;;  %s2740_s19 = smov 8  }
  0x1c   :  { %37 = dma.hbm_to_vmem [thread:$0]  %s3707_s1, 512, %s32_s16, [#allocation5], %s2739_s18, %s2739_s18, %s2740_s19  }
  0x1d   :  { %s2741_s2 = smov [#allocation11]   ;;  %s2742_s0 = smov [#allocation12]  }
  0x1e   :  { %s55_s22 = sshll.u32 %s2741_s2, 4  ;;  %s71_s23 = sshll.u32 %s2742_s0, 4  ;;  %s56_s22 = int_to_ptr.vmem [resolvable:$true] %s55_s22  ;;  %s72_s23 = int_to_ptr.vmem [resolvable:$true] %s71_s23 }
  0x1f   :  { %s2672_s24 = scalar_lea.vmem %s56_s22, 6144  ;;  %p2677_p11 = scmp.lt.s32.totalorder %s56_s22, %s56_s22 }
  0x20   :  { %p2673_p10 = scmp.ne.s32.totalorder %s56_s22, %s2672_s24  ;;  %p2678_p12 = scmp.lt.s32.totalorder %s2672_s24, %s2672_s24 }
  0x22   :  { %p2679_p13 = por %p2678_p12, %p2677_p11 }
  0x24   :  { %p2680_p0 = pnand %p2679_p13, %p2673_p10 }
  0x26   :  { %2683 = shalt.err (!%p2680_p0)
}
  0x27   :  { %61 = dma.hbm_to_vmem [thread:$0]  %s3709_s3, 6144, %s56_s22, [#allocation10], %s2735_s30, %s2735_s30, %s2736_s9  }
  0x28   :  { %s2692_s1 = scalar_lea.vmem %s72_s23, 2048  ;;  %p2697_p2 = scmp.lt.s32.totalorder %s72_s23, %s72_s23 }
  0x29   :  { %p2693_p1 = scmp.ne.s32.totalorder %s72_s23, %s2692_s1  ;;  %p2698_p3 = scmp.lt.s32.totalorder %s2692_s1, %s2692_s1 }
  0x2b   :  { %p2699_p4 = por %p2698_p3, %p2697_p2 }
  0x2d   :  { %p2700_p5 = pnand %p2699_p4, %p2693_p1 }
  0x2f   :  { %2703 = shalt.err (!%p2700_p5)
}
  0x30   :  { %77 = dma.hbm_to_vmem [thread:$0]  %s3712_s6, 2048, %s72_s23, [#allocation13], %s2739_s18, %s2739_s18, %s2740_s19  }
  0x31   :  { %2724 = dma.done.wait [#allocation7], 16  }
  0x32   :  { %2725 = vsyncadd [#allocation7], 4294967280 }
  0x33   :  { %2726 = dma.done.wait [#allocation5], 512  }
  0x34   :  { %2727 = vsyncadd [#allocation5], 4294966784 }
  0x35   :  { %2728 = dma.done.wait [#allocation10], 7680  }
  0x36   :  { %2729 = vsyncadd [#allocation10], 4294959616 }
  0x37   :  { %2730 = dma.done.wait [#allocation13], 2048  }
  0x38   :  { %2731 = vsyncadd [#allocation13], 4294965248 }
  0x39   :  { %95 = sfence }
  0x3a   :  { %v2813_v0 = vld [vmem:[#allocation11 + $0x170] sm:$0xff]  ;;  %v2815_v1 = vld [vmem:[#allocation11 + $0x168] sm:$0xff]  ;;  %v2817_v2 = vld [vmem:[#allocation11 + $0x158] sm:$0xff]  ;;  %s2819_s3 = sld [smem:[#allocation4]]  ;;  %v3715_v4 = vmov 0.0   ;;  %vm103_vm0 = vcmask 253952  }
  0x3b   :  { %3733 = vst [vmem:[#allocation20_spill] sm:$0xff] %v2813_v0  ;;  %388 = vmatprep.subr.mxu0 %v2813_v0  ;;  %v2822_v3 = vld [vmem:[#allocation11 + $0x150] sm:$0xff]  ;;  %259 = vmatprep.mubr.f32.mxu1 %v3715_v4  ;;  %s2825_s6 = sld [smem:[#allocation4 + $0x1]]  ;;  %v2828_v5 = vld [vmem:[#allocation11 + $0x140] sm:$0xff]  ;;  %v2834_v6 = vld [vmem:[#allocation11 + $0x138] sm:$0xff]  ;;  %vm191_vm1 = vcmask 261120  }
  0x3c   :  { %389 = vmatpush1.msra.mxu0 %v2815_v1  ;;  %s2830_s29 = sld [smem:[#allocation4 + $0x2]]  ;;  %452 = vmatprep.mubr.f32.mxu0 %v3715_v4  ;;  %v2839_v7 = vld [vmem:[#allocation11 + $0x128] sm:$0xff]  ;;  %v172_v8 = vld [vmem:[#allocation9 + $0x50] sm:$0xff]  ;;  %v2844_v10 = vld [vmem:[#allocation11 + $0x120] sm:$0xff]  ;;  %vm2744_vm2 = vmmov 0  }
  0x3d   :  { %390 = vmatprep.subr.mxu0 %v2817_v2  ;;  %s2836_s30 = sld [smem:[#allocation4 + $0x3]]  ;;  %v171_v9 = vld [vmem:[#allocation9 + $0x48] sm:$0xff]  ;;  %219 = vmatprep.subr.mxu1 %v172_v8  ;;  %v169_v11 = vld [vmem:[#allocation9 + $0x38] sm:$0xff]  ;;  %v2849_v12 = vld [vmem:[#allocation11 + $0x110] sm:$0xff] }
  0x3e   :  { %391 = vmatpush1.msra.mxu0 %v2822_v3  ;;  %s2841_s9 = sld [smem:[#allocation4 + $0x4]]  ;;  %220 = vmatpush1.msra.mxu1 %v171_v9  ;;  %v168_v13 = vld [vmem:[#allocation9 + $0x30] sm:$0xff]  ;;  %v166_v14 = vld [vmem:[#allocation9 + $0x20] sm:$0xff]  ;;  %v2854_v15 = vld [vmem:[#allocation11 + $0x108] sm:$0xff] }
  0x3f   :  { %392 = vmatprep.subr.mxu0 %v2828_v5  ;;  %s2846_s10 = sld [smem:[#allocation4 + $0x5]]  ;;  %221 = vmatprep.subr.mxu1 %v169_v11  ;;  %v165_v16 = vld [vmem:[#allocation9 + $0x18] sm:$0xff]  ;;  %v163_v18 = vld [vmem:[#allocation9 + $0x8] sm:$0xff]  ;;  %v2863_v19 = vld [vmem:[#allocation11 + $0xf0] sm:$0xff] }
  0x40   :  { %393 = vmatpush1.msra.mxu0 %v2834_v6  ;;  %p97_p6 = scmp.gt.s32.totalorder %s2819_s3, 0  ;;  %p1949_p7 = scmp.lt.s32.totalorder %s2819_s3, 31  ;;  %v2859_v17 = vld [vmem:[#allocation11 + $0xf8] sm:$0xff]  ;;  %222 = vmatpush1.msra.mxu1 %v168_v13  ;;  %v162_v20 = vld [vmem:[#allocation9] sm:$0xff]  ;;  %v2877_v23 = vld [vmem:[#allocation11 + $0xc8] sm:$0xff] }
  0x41   :  { %394 = vmatprep.subr.mxu0 %v2839_v7  ;;  %p106_p8 = scmp.gt.s32.totalorder %s2825_s6, 0  ;;  %p1955_p9 = scmp.lt.s32.totalorder %s2825_s6, 31  ;;  %223 = vmatprep.subr.mxu1 %v166_v14  ;;  %v2867_v21 = vld [vmem:[#allocation11 + $0xe0] sm:$0xff]  ;;  %v2872_v22 = vld [vmem:[#allocation11 + $0xd8] sm:$0xff]  ;;  %v2886_v26 = vld [vmem:[#allocation11 + $0xb0] sm:$0xff] }
  0x42   :  { %395 = vmatpush1.msra.mxu0 %v2844_v10  ;;  %s98_s11 = scalar_select %p97_p6, %s2819_s3, 0  ;;  %224 = vmatpush1.msra.mxu1 %v165_v16  ;;  %v2881_v24 = vld [vmem:[#allocation11 + $0xc0] sm:$0xff]  ;;  %v2891_v28 = vld [vmem:[#allocation11 + $0xa8] sm:$0xff]  ;;  %v2897_v29 = vld [vmem:[#allocation11 + $0x98] sm:$0xff] }
  0x43   :  { %396 = vmatprep.subr.mxu0 %v2849_v12  ;;  %s107_s12 = scalar_select %p106_p8, %s2825_s6, 0  ;;  %225 = vmatprep.subr.mxu1 %v163_v18  ;;  %v2902_v30 = vld [vmem:[#allocation11 + $0x90] sm:$0xff]  ;;  %v2906_v31 = vld [vmem:[#allocation11 + $0x80] sm:$0xff]  ;;  %v2910_v33 = vld [vmem:[#allocation11 + $0x78] sm:$0xff]  ;;  %v176_v18 = vlaneseq }
  0x44   :  { %397 = vmatpush1.msra.mxu0 %v2854_v15  ;;  %s3760_s11 = smov (!%p1949_p7, %s98_s11), 31  ;;  %226 = vmatpush1.msra.mxu1 %v162_v20  ;;  %p114_p10 = scmp.gt.s32.totalorder %s2830_s29, 0  ;;  %v2915_v34 = vld [vmem:[#allocation11 + $0x68] sm:$0xff]  ;;  %v2919_v35 = vld [vmem:[#allocation11 + $0x60] sm:$0xff]  ;;  %v2924_v37 = vld [vmem:[#allocation11 + $0x50] sm:$0xff] }
  0x45   :  { %398 = vmatprep.subr.mxu0 %v2859_v17  ;;  %s3762_s12 = smov (!%p1955_p9, %s107_s12), 31  ;;  %2180 = vmatprep.subr.mxu1 %v3715_v4  ;;  %s101_s13 = scalar_lea.vmem [#allocation8], %s3760_s11  ;;  %v2928_v38 = vld [vmem:[#allocation11 + $0x48] sm:$0xff]  ;;  %v2932_v39 = vld [vmem:[#allocation11 + $0x38] sm:$0xff]  ;;  %v2937_v40 = vld [vmem:[#allocation11 + $0x30] sm:$0xff]  ;;  %v177_v20 = vshrl.u32 %v176_v18, 7 }
  0x46   :  { %399 = vmatpush1.msra.mxu0 %v2863_v19  ;;  %v102_v25 = vld [vmem:[%s101_s13] sm:$0x1]  ;;  %p1961_p11 = scmp.lt.s32.totalorder %s2830_s29, 31  ;;  %s110_s14 = scalar_lea.vmem [#allocation8], %s3762_s12  ;;  %v2948_v43 = vld [vmem:[#allocation11 + $0x18] sm:$0xff]  ;;  %v2951_v44 = vld [vmem:[#allocation11 + $0x8] sm:$0xff] }
  0x47   :  { %400 = vmatprep.subr.mxu0 %v2867_v21  ;;  %104 = vst.msk [vmem:[#allocation2] sm:$0x1] %vm103_vm0, %v102_v25  ;;  %v111_v27 = vld [vmem:[%s110_s14] sm:$0x1]  ;;  %s115_s15 = scalar_select %p114_p10, %s2830_s29, 0  ;;  %3734 = vst [vmem:[#allocation21_spill] sm:$0xff] %v2948_v43 }
  0x48   :  { %401 = vmatpush1.msra.mxu0 %v2872_v22  ;;  %112 = vst.msk [vmem:[#allocation2 + $0x1] sm:$0x1] %vm103_vm0, %v111_v27  ;;  %p122_p12 = scmp.gt.s32.totalorder %s2836_s30, 0  ;;  %p1967_p13 = scmp.lt.s32.totalorder %s2836_s30, 31  ;;  %v2942_v42 = vld [vmem:[#allocation11 + $0x20] sm:$0xff]  ;;  %3735 = vst [vmem:[#allocation22_spill] sm:$0xff] %v2951_v44 }
  0x49   :  { %402 = vmatprep.subr.mxu0 %v2877_v23  ;;  %s3764_s15 = smov (!%p1961_p11, %s115_s15), 31  ;;  %p130_p0 = scmp.gt.s32.totalorder %s2841_s9, 0  ;;  %v2954_v46 = vld [vmem:[#allocation11] sm:$0xff]  ;;  %v173_v49 = vld [vmem:[#allocation9 + $0x58] sm:$0xff]  ;;  %v167_v52 = vld [vmem:[#allocation9 + $0x28] sm:$0xff]  ;;  %v178_v25 = vsub.s32 0, %v177_v20 }
  0x4a   :  { %403 = vmatpush1.msra.mxu0 %v2881_v24  ;;  %s3766_s30 = smov (!%p122_p12, %s2836_s30), 0  ;;  %s118_s16 = scalar_lea.vmem [#allocation8], %s3764_s15  ;;  %3736 = vst [vmem:[#allocation23_spill] sm:$0xff] %v2954_v46  ;;  %v170_v51 = vld [vmem:[#allocation9 + $0x40] sm:$0xff]  ;;  %v164_v53 = vld [vmem:[#allocation9 + $0x10] sm:$0xff]  ;;  %v2998_v54 = vld [vmem:[#allocation11 + $0x178] sm:$0xff] }
  0x4b   :  { %404 = vmatprep.subr.mxu0 %v2886_v26  ;;  %v119_v32 = vld [vmem:[%s118_s16] sm:$0x1]  ;;  %s3768_s30 = smov (!%p1967_p13, %s3766_s30), 31  ;;  %p1973_p1 = scmp.lt.s32.totalorder %s2841_s9, 31  ;;  %v3010_v56 = vld [vmem:[#allocation11 + $0x148] sm:$0xff]  ;;  %v3016_v57 = vld [vmem:[#allocation11 + $0x130] sm:$0xff] }
  0x4c   :  { %405 = vmatpush1.msra.mxu0 %v2891_v28  ;;  %120 = vst.msk [vmem:[#allocation2 + $0x2] sm:$0x1] %vm103_vm0, %v119_v32  ;;  %s131_s17 = scalar_select %p130_p0, %s2841_s9, 0  ;;  %v3004_v55 = vld [vmem:[#allocation11 + $0x160] sm:$0xff]  ;;  %v3022_v58 = vld [vmem:[#allocation11 + $0x118] sm:$0xff]  ;;  %v3034_v60 = vld [vmem:[#allocation11 + $0xe8] sm:$0xff] }
  0x4d   :  { %406 = vmatprep.subr.mxu0 %v2897_v29  ;;  %s126_s18 = scalar_lea.vmem [#allocation8], %s3768_s30  ;;  %p138_p2 = scmp.gt.s32.totalorder %s2846_s10, 0  ;;  %v3028_v59 = vld [vmem:[#allocation11 + $0x100] sm:$0xff]  ;;  %v3039_v61 = vld [vmem:[#allocation11 + $0xd0] sm:$0xff]  ;;  %v3043_v62 = vld [vmem:[#allocation11 + $0xb8] sm:$0xff]  ;;  %v182_v32 = vsub.s32 1, %v177_v20 }
  0x4e   :  { %407 = vmatpush1.msra.mxu0 %v2902_v30  ;;  %v127_v36 = vld [vmem:[%s126_s18] sm:$0x1]  ;;  %p1979_p3 = scmp.lt.s32.totalorder %s2846_s10, 31  ;;  %s3770_s17 = smov (!%p1973_p1, %s131_s17), 31  ;;  %v3051_v8 = vld [vmem:[#allocation11 + $0x88] sm:$0xff]  ;;  %v3055_v9 = vld [vmem:[#allocation11 + $0x70] sm:$0xff] }
  0x4f   :  { %408 = vmatprep.subr.mxu0 %v2906_v31  ;;  %128 = vst.msk [vmem:[#allocation2 + $0x3] sm:$0x1] %vm103_vm0, %v127_v36  ;;  %s139_s19 = scalar_select %p138_p2, %s2846_s10, 0  ;;  %v3047_v63 = vld [vmem:[#allocation11 + $0xa0] sm:$0xff]  ;;  %v3059_v11 = vld [vmem:[#allocation11 + $0x58] sm:$0xff]  ;;  %v3067_v14 = vld [vmem:[#allocation11 + $0x28] sm:$0xff] }
  0x50   :  { %409 = vmatpush1.msra.mxu0 %v2910_v33  ;;  %s2934_s20 = sld [smem:[#allocation4 + $0x6]]  ;;  %s134_s21 = scalar_lea.vmem [#allocation8], %s3770_s17  ;;  %v3063_v13 = vld [vmem:[#allocation11 + $0x40] sm:$0xff]  ;;  %3737 = vst [vmem:[#allocation24_spill] sm:$0xff] %v3067_v14  ;;  %v3071_v16 = vld [vmem:[#allocation11 + $0x10] sm:$0xff] }
  0x51   :  { %410 = vmatprep.subr.mxu0 %v2915_v34  ;;  %v135_v41 = vld [vmem:[%s134_s21] sm:$0x1]  ;;  %s3772_s19 = smov (!%p1979_p3, %s139_s19), 31  ;;  %s2945_s2 = sld [smem:[#allocation4 + $0x7]]  ;;  %3738 = vst [vmem:[#allocation25_spill] sm:$0xff] %v3071_v16 }
  0x52   :  { %411 = vmatpush1.msra.mxu0 %v2919_v35  ;;  %136 = vst.msk [vmem:[#allocation2 + $0x4] sm:$0x1] %vm103_vm0, %v135_v41  ;;  %s142_s22 = scalar_lea.vmem [#allocation8], %s3772_s19  ;;  %v174_v27 = vld [vmem:[%s3710_s4] sm:$0x7]  ;;  %s2746_s3 = smov [#allocation14]  }
  0x53   :  { %412 = vmatprep.subr.mxu0 %v2924_v37  ;;  %v143_v45 = vld [vmem:[%s142_s22] sm:$0x1]  ;;  %v179_v36 = vrot.slane %v174_v27, %v178_v25  ;;  %v2745_v41 = vmov 1966171168   ;;  %s1929_s6 = sshll.u32 %s2746_s3, 4  ;;  %s1930_s6 = int_to_ptr.vmem [resolvable:$true] %s1929_s6 }
  0x54   :  { %413 = vmatpush1.msra.mxu0 %v2928_v38  ;;  %144 = vst.msk [vmem:[#allocation2 + $0x5] sm:$0x1] %vm103_vm0, %v143_v45  ;;  %v533_v45 = vunpack.c.l.s4 %v2745_v41  ;;  %s2704_s29 = scalar_lea.vmem %s1930_s6, 16  ;;  %s2708_s30 = scalar_lea.vmem %s1930_s6, 32 }
  0x55   :  { %414 = vmatprep.subr.mxu0 %v2932_v39  ;;  %p2705_p8 = scmp.ne.s32.totalorder %s1930_s6, %s2704_s29  ;;  %p2709_p9 = scmp.lt.s32.totalorder %s1930_s6, %s1930_s6 }
  0x56   :  { %415 = vmatpush1.msra.mxu0 %v2937_v40  ;;  %p146_p4 = scmp.gt.s32.totalorder %s2934_s20, 0  ;;  %p1985_p5 = scmp.lt.s32.totalorder %s2934_s20, 31 }
  0x57   :  { %416 = vmatprep.subr.mxu0 %v2942_v42  ;;  %p154_p6 = scmp.gt.s32.totalorder %s2945_s2, 0  ;;  %p1991_p7 = scmp.lt.s32.totalorder %s2945_s2, 31 }
  0x58   :  { %417 = vmatpush1.msra.mxu0 %v2948_v43  ;;  %s3774_s20 = smov (!%p146_p4, %s2934_s20), 0  ;;  %p2710_p10 = scmp.lt.s32.totalorder %s2708_s30, %s2704_s29 }
  0x59   :  { %418 = vmatprep.subr.mxu0 %v2951_v44  ;;  %s3776_s20 = smov (!%p1985_p5, %s3774_s20), 31  ;;  %s3778_s2 = smov (!%p154_p6, %s2945_s2), 0 }
  0x5a   :  { %419 = vmatpush1.msra.mxu0 %v2954_v46  ;;  %s150_s0 = scalar_lea.vmem [#allocation8], %s3776_s20  ;;  %s3780_s2 = smov (!%p1991_p7, %s3778_s2), 31 }
  0x5b   :  { %453 = vmatmul.mubr.f32.vlgmr.msra.gmra.mxu0 %v3715_v4  ;;  %570 = vmatprep.subr.mxu0 %v2813_v0  ;;  %v151_v47 = vld [vmem:[%s150_s0] sm:$0x1]  ;;  %s158_s23 = scalar_lea.vmem [#allocation8], %s3780_s2  ;;  %p2711_p11 = por %p2710_p10, %p2709_p9 }
  0x5c   :  { %571 = vmatpush1.msra.mxu0 %v2815_v1  ;;  %634 = vmatprep.mubr.f32.mxu0 %v3715_v4  ;;  %152 = vst.msk [vmem:[#allocation2 + $0x6] sm:$0x1] %vm103_vm0, %v151_v47  ;;  %v159_v48 = vld [vmem:[%s158_s23] sm:$0x1]  ;;  %v183_v47 = vrot.slane %v174_v27, %v182_v32 }
  0x5d   :  { %572 = vmatprep.subr.mxu0 %v2817_v2  ;;  %160 = vst.msk [vmem:[#allocation2 + $0x7] sm:$0x1] %vm103_vm0, %v159_v48  ;;  %p2712_p12 = pnand %p2711_p11, %p2705_p8 }
  0x5e   :  { %573 = vmatpush1.msra.mxu0 %v2822_v3 }
  0x5f   :  { %574 = vmatprep.subr.mxu0 %v2828_v5 }
  0x60   :  { %575 = vmatpush1.msra.mxu0 %v2834_v6 }
  0x61   :  { %576 = vmatprep.subr.mxu0 %v2839_v7 }
  0x62   :  { %577 = vmatpush1.msra.mxu0 %v2844_v10 }
  0x63   :  { %578 = vmatprep.subr.mxu0 %v2849_v12 }
  0x64   :  { %579 = vmatpush1.msra.mxu0 %v2854_v15  ;;  %v161_v50 = vld [vmem:[#allocation2] sm:$0xff] }
  0x65   :  { %580 = vmatprep.subr.mxu0 %v2859_v17  ;;  %1996 = vmatmul.mubr.msk.f32.vlgmr.msra.gmra.mxu1 %vm191_vm1, %v161_v50 }
  0x66   :  { %581 = vmatpush1.msra.mxu0 %v2863_v19  ;;  %2181 = vmatpush3.msra.mxu1 %v173_v49 }
  0x67   :  { %582 = vmatprep.subr.mxu0 %v2867_v21  ;;  %2188 = vmatprep.mubr.msk.f32.mxu1 %vm2744_vm2, %v3715_v4 }
  0x68   :  { %583 = vmatpush1.msra.mxu0 %v2872_v22  ;;  %2182 = vmatprep.subr.mxu1 %v3715_v4 }
  0x69   :  { %584 = vmatprep.subr.mxu0 %v2877_v23  ;;  %2183 = vmatpush3.msra.mxu1 %v170_v51  ;;  %v186_v51 = vsub.s32 2, %v177_v20 }
  0x6a   :  { %585 = vmatpush1.msra.mxu0 %v2881_v24  ;;  %2184 = vmatprep.subr.mxu1 %v3715_v4 }
  0x6b   :  { %586 = vmatprep.subr.mxu0 %v2886_v26  ;;  %2185 = vmatpush3.msra.mxu1 %v167_v52  ;;  %v187_v18 = vrot.slane %v174_v27, %v186_v51 }
  0x6c   :  { %587 = vmatpush1.msra.mxu0 %v2891_v28  ;;  %2186 = vmatprep.subr.mxu1 %v3715_v4 }
  0x6d   :  { %588 = vmatprep.subr.mxu0 %v2897_v29  ;;  %2187 = vmatpush3.msra.mxu1 %v164_v53  ;;  %v534_v53 = vunpack.c.0.s8 %v533_v45 }
  0x6e   :  { %589 = vmatpush1.msra.mxu0 %v2902_v30  ;;  %2189 = vmatmul.mubr.msk.f32.vlgmr.msra.gmra.mxu1 %vm191_vm1, %v161_v50 }
  0x6f   :  { %590 = vmatprep.subr.mxu0 %v2906_v31  ;;  %2191 = vmatprep.subr.mxu1 %v3715_v4 }
  0x70   :  { %591 = vmatpush1.msra.mxu0 %v2910_v33  ;;  %2192 = vmatpush3.msra.mxu1 %v2998_v54 }
  0x71   :  { %592 = vmatprep.subr.mxu0 %v2915_v34  ;;  %2223 = vmatprep.mubr.msk.f32.mxu1 %vm2744_vm2, %v3715_v4 }
  0x72   :  { %593 = vmatpush1.msra.mxu0 %v2919_v35  ;;  %2193 = vmatprep.subr.mxu1 %v3715_v4 }
  0x73   :  { %594 = vmatprep.subr.mxu0 %v2924_v37  ;;  %2194 = vmatpush3.msra.mxu1 %v3004_v55 }
  0x74   :  { %595 = vmatpush1.msra.mxu0 %v2928_v38  ;;  %2195 = vmatprep.subr.mxu1 %v3715_v4 }
  0x75   :  { %596 = vmatprep.subr.mxu0 %v2932_v39  ;;  %2196 = vmatpush3.msra.mxu1 %v3010_v56 }
  0x76   :  { %597 = vmatpush1.msra.mxu0 %v2937_v40  ;;  %2197 = vmatprep.subr.mxu1 %v3715_v4 }
  0x77   :  { %598 = vmatprep.subr.mxu0 %v2942_v42  ;;  %2198 = vmatpush3.msra.mxu1 %v3016_v57 }
  0x78   :  { %599 = vmatpush1.msra.mxu0 %v2948_v43  ;;  %2199 = vmatprep.subr.mxu1 %v3715_v4 }
  0x79   :  { %600 = vmatprep.subr.mxu0 %v2951_v44  ;;  %2200 = vmatpush3.msra.mxu1 %v3022_v58 }
  0x7a   :  { %601 = vmatpush1.msra.mxu0 %v2954_v46  ;;  %2201 = vmatprep.subr.mxu1 %v3715_v4 }
  0x7b   :  { %751 = vmatprep.subr.mxu0 %v2813_v0  ;;  %2202 = vmatpush3.msra.mxu1 %v3028_v59 }
  0x7c   :  { %2203 = vmatprep.subr.mxu1 %v3715_v4 }
  0x7d   :  { %2204 = vmatpush3.msra.mxu1 %v3034_v60 }
  0x7e   :  { %2205 = vmatprep.subr.mxu1 %v3715_v4 }
  0x7f   :  { %2206 = vmatpush3.msra.mxu1 %v3039_v61 }
  0x80   :  { %2207 = vmatprep.subr.mxu1 %v3715_v4 }
  0x81   :  { %2208 = vmatpush3.msra.mxu1 %v3043_v62 }
  0x82   :  { %2209 = vmatprep.subr.mxu1 %v3715_v4 }
  0x83   :  { %2210 = vmatpush3.msra.mxu1 %v3047_v63 }
  0x84   :  { %2211 = vmatprep.subr.mxu1 %v3715_v4 }
  0x85   :  { %2212 = vmatpush3.msra.mxu1 %v3051_v8 }
  0x86   :  { %2213 = vmatprep.subr.mxu1 %v3715_v4 }
  0x87   :  { %2214 = vmatpush3.msra.mxu1 %v3055_v9 }
  0x88   :  { %2215 = vmatprep.subr.mxu1 %v3715_v4 }
  0x89   :  { %2216 = vmatpush3.msra.mxu1 %v3059_v11 }
  0x8a   :  { %2217 = vmatprep.subr.mxu1 %v3715_v4 }
  0x8b   :  { %2218 = vmatpush3.msra.mxu1 %v3063_v13 }
  0x8c   :  { %2219 = vmatprep.subr.mxu1 %v3715_v4 }
  0x8d   :  { %2220 = vmatpush3.msra.mxu1 %v3067_v14 }
  0x8e   :  { %2221 = vmatprep.subr.mxu1 %v3715_v4 }
  0x8f   :  { %2222 = vmatpush3.msra.mxu1 %v3071_v16 }
  0x90   :  { %2224 = vmatmul.mubr.f32.vlgmr.msra.gmra.mxu1 %v3715_v4  ;;  %2226 = vmatprep.subr.mxu1 %v3715_v4 }
  0x91   :  { %2227 = vmatpush3.msra.mxu1 %v2998_v54  ;;  %2258 = vmatprep.mubr.msk.f32.mxu1 %vm2744_vm2, %v3715_v4 }
  0x92   :  { %2228 = vmatprep.subr.mxu1 %v3715_v4 }
  0x93   :  { %2229 = vmatpush3.msra.mxu1 %v3004_v55 }
  0x94   :  { %2230 = vmatprep.subr.mxu1 %v3715_v4 }
  0x95   :  { %2231 = vmatpush3.msra.mxu1 %v3010_v56 }
  0x96   :  { %2232 = vmatprep.subr.mxu1 %v3715_v4 }
  0x97   :  { %2233 = vmatpush3.msra.mxu1 %v3016_v57 }
  0x98   :  { %2234 = vmatprep.subr.mxu1 %v3715_v4 }
  0x99   :  { %2235 = vmatpush3.msra.mxu1 %v3022_v58 }
  0x9a   :  { %2236 = vmatprep.subr.mxu1 %v3715_v4 }
  0x9b   :  { %2237 = vmatpush3.msra.mxu1 %v3028_v59 }
  0x9c   :  { %2238 = vmatprep.subr.mxu1 %v3715_v4 }
  0x9d   :  { %2239 = vmatpush3.msra.mxu1 %v3034_v60 }
  0x9e   :  { %2240 = vmatprep.subr.mxu1 %v3715_v4 }
  0x9f   :  { %2241 = vmatpush3.msra.mxu1 %v3039_v61 }
  0xa0   :  { %2242 = vmatprep.subr.mxu1 %v3715_v4 }
  0xa1   :  { %2243 = vmatpush3.msra.mxu1 %v3043_v62 }
  0xa2   :  { %2244 = vmatprep.subr.mxu1 %v3715_v4 }
  0xa3   :  { %2245 = vmatpush3.msra.mxu1 %v3047_v63 }
  0xa4   :  { %2246 = vmatprep.subr.mxu1 %v3715_v4 }
  0xa5   :  { %2247 = vmatpush3.msra.mxu1 %v3051_v8 }
  0xa6   :  { %2248 = vmatprep.subr.mxu1 %v3715_v4 }
  0xa7   :  { %2249 = vmatpush3.msra.mxu1 %v3055_v9 }
  0xa8   :  { %2250 = vmatprep.subr.mxu1 %v3715_v4 }
  0xa9   :  { %2251 = vmatpush3.msra.mxu1 %v3059_v11 }
  0xaa   :  { %2252 = vmatprep.subr.mxu1 %v3715_v4 }
  0xab   :  { %2253 = vmatpush3.msra.mxu1 %v3063_v13 }
  0xac   :  { %2254 = vmatprep.subr.mxu1 %v3715_v4 }
  0xad   :  { %2255 = vmatpush3.msra.mxu1 %v3067_v14 }
  0xae   :  { %2256 = vmatprep.subr.mxu1 %v3715_v4 }
  0xaf   :  { %2257 = vmatpush3.msra.mxu1 %v3071_v16  ;;  %v3115_v16 = vsub.s32 %v534_v53, %v177_v20 }
  0xb0   :  { %2261 = vmatprep.subr.mxu1 %v3715_v4 }
 0x11b   :  { %v454_v49 = vpop.f32.mrf.mxu0 }
 0x11d   :  { %v456_v0 = vpop.f32.mrf.mxu0 }
 0x11e   :  { %v531_v46 = vcombine.low %v454_v49, %v456_v0  ;;  %v3122_v0 = vld [vmem:[%s3711_s5] sm:$0x1] }
 0x120   :  { %v538_v32 = vrot.slane %v531_v46, %v3115_v16 }
 0x122   :  { %v545_v41 = vrot.slane %v538_v32, %v3115_v16  ;;  %v3741_v32 = vld [vmem:[#allocation24_spill] sm:$0xff] }
 0x125   :  { %v261_v48 = vpop.f32.mrf.mxu1 }
 0x126   :  { %v262_v50 = vadd.f32 %v261_v48, %v179_v36 }
 0x127   :  { %v263_v52 = vpop.f32.mrf.mxu1 }
 0x128   :  { %336 = vst [vmem:[#allocation3] sm:$0xff] %v262_v50  ;;  %v264_v4 = vadd.f32 %v263_v52, %v183_v47 }
 0x12a   :  { %337 = vst [vmem:[#allocation3 + $0x8] sm:$0xff] %v264_v4 }
 0x12e   :  { %v332_v44 = vpop.f32.mrf.mxu1 }
 0x12f   :  { %v333_v14 = vadd.f32 %v332_v44, %v187_v18  ;;  %v3739_v18 = vmov 0.0  }
 0x130   :  { %v2190_v25 = vpop.f32.mrf.mxu1 }
 0x131   :  { %338 = vst [vmem:[#allocation3 + $0x10] sm:$0xff] %v333_v14  ;;  %v3740_v25 = vld [vmem:[#allocation21_spill] sm:$0xff] }
 0x138   :  { %v339_v36 = vld [vmem:[#allocation3] ss:$8 sm:$0x7] }
 0x139   :  { %v547_v48 = vadd.f32 %v545_v41, %v339_v36  ;;  %v558_v20 = vrot.slane %v339_v36, 2  ;;  %v3742_v41 = vld [vmem:[#allocation22_spill] sm:$0xff]  ;;  %v3743_v36 = vld [vmem:[#allocation23_spill] sm:$0xff] }
 0x13b   :  { %v1998_v43 = vmul.f32 -1.442695, %v547_v48  ;;  %v3744_v48 = vld [vmem:[#allocation25_spill] sm:$0xff] }
 0x13d   :  { %2519 = vpow2.f32 %v1998_v43 }
 0x14a   :  { %v2520_v45 = vpop.eup %2519 }
 0x14b   :  { %v551_v47 = vadd.f32 1.0, %v2520_v45  ;;  %v3745_v45 = vld [vmem:[#allocation20_spill] sm:$0xff] }
 0x14d   :  { %2521 = vrcp.f32 %v551_v47 }
 0x150   :  { %v525_v4 = vpop.f32.mrf.mxu1 }
 0x151   :  { %v555_v44 = vadd.f32 %v3122_v0, %v525_v4 }
 0x152   :  { %v2225_v27 = vpop.f32.mrf.mxu1 }
 0x15a   :  { %v2522_v14 = vpop.eup %2521 }
 0x15b   :  { %v556_v46 = vmul.f32 %v2522_v14, %v555_v44  ;;  %v564_v43 = vrot.slane %v2522_v14, 1 }
 0x15d   :  { %v560_v49 = vadd.f32 %v558_v20, %v556_v46 }
 0x15f   :  { %2523 = vtanh.f32 %v560_v49  ;;  %v569_v49 = vld [vmem:[#allocation3 + $0x1] ss:$8 sm:$0x7] }
 0x16c   :  { %v2524_v50 = vpop.eup %2523 }
 0x16d   :  { %v562_v51 = vsub.f32 0.0, %v2524_v50 }
 0x16f   :  { %v566_v52 = vmul.f32 %v564_v43, %v562_v51 }
 0x171   :  { %v3125_v53 = vadd.f32 %v2524_v50, %v566_v52 }
 0x173   :  { %635 = vmatmul.mubr.f32.vlgmr.msra.gmra.mxu0 %v3125_v53  ;;  %2259 = vmatmul.mubr.f32.vlgmr.msra.gmra.mxu1 %v3125_v53 }
 0x174   :  { %752 = vmatpush1.msra.mxu0 %v2815_v1  ;;  %2262 = vmatpush3.msra.mxu1 %v2998_v54 }
 0x175   :  { %753 = vmatprep.subr.mxu0 %v2817_v2  ;;  %2263 = vmatprep.subr.mxu1 %v3739_v18 }
 0x176   :  { %754 = vmatpush1.msra.mxu0 %v2822_v3  ;;  %2264 = vmatpush3.msra.mxu1 %v3004_v55 }
 0x177   :  { %755 = vmatprep.subr.mxu0 %v2828_v5  ;;  %2265 = vmatprep.subr.mxu1 %v3739_v18 }
 0x178   :  { %756 = vmatpush1.msra.mxu0 %v2834_v6  ;;  %2266 = vmatpush3.msra.mxu1 %v3010_v56 }
 0x179   :  { %757 = vmatprep.subr.mxu0 %v2839_v7  ;;  %2267 = vmatprep.subr.mxu1 %v3739_v18 }
 0x17a   :  { %758 = vmatpush1.msra.mxu0 %v2844_v10  ;;  %2268 = vmatpush3.msra.mxu1 %v3016_v57 }
 0x17b   :  { %759 = vmatprep.subr.mxu0 %v2849_v12  ;;  %2269 = vmatprep.subr.mxu1 %v3739_v18 }
 0x17c   :  { %760 = vmatpush1.msra.mxu0 %v2854_v15  ;;  %2270 = vmatpush3.msra.mxu1 %v3022_v58 }
 0x17d   :  { %761 = vmatprep.subr.mxu0 %v2859_v17  ;;  %2271 = vmatprep.subr.mxu1 %v3739_v18 }
 0x17e   :  { %762 = vmatpush1.msra.mxu0 %v2863_v19  ;;  %2272 = vmatpush3.msra.mxu1 %v3028_v59 }
 0x17f   :  { %763 = vmatprep.subr.mxu0 %v2867_v21  ;;  %2273 = vmatprep.subr.mxu1 %v3739_v18 }
 0x180   :  { %764 = vmatpush1.msra.mxu0 %v2872_v22  ;;  %2274 = vmatpush3.msra.mxu1 %v3034_v60 }
 0x181   :  { %765 = vmatprep.subr.mxu0 %v2877_v23  ;;  %2275 = vmatprep.subr.mxu1 %v3739_v18 }
 0x182   :  { %766 = vmatpush1.msra.mxu0 %v2881_v24  ;;  %2276 = vmatpush3.msra.mxu1 %v3039_v61 }
 0x183   :  { %767 = vmatprep.subr.mxu0 %v2886_v26  ;;  %2277 = vmatprep.subr.mxu1 %v3739_v18 }
 0x184   :  { %768 = vmatpush1.msra.mxu0 %v2891_v28  ;;  %2278 = vmatpush3.msra.mxu1 %v3043_v62 }
 0x185   :  { %769 = vmatprep.subr.mxu0 %v2897_v29  ;;  %2279 = vmatprep.subr.mxu1 %v3739_v18 }
 0x186   :  { %770 = vmatpush1.msra.mxu0 %v2902_v30  ;;  %2280 = vmatpush3.msra.mxu1 %v3047_v63 }
 0x187   :  { %771 = vmatprep.subr.mxu0 %v2906_v31  ;;  %2281 = vmatprep.subr.mxu1 %v3739_v18 }
 0x188   :  { %772 = vmatpush1.msra.mxu0 %v2910_v33  ;;  %2282 = vmatpush3.msra.mxu1 %v3051_v8 }
 0x189   :  { %773 = vmatprep.subr.mxu0 %v2915_v34  ;;  %2283 = vmatprep.subr.mxu1 %v3739_v18 }
 0x18a   :  { %774 = vmatpush1.msra.mxu0 %v2919_v35  ;;  %2284 = vmatpush3.msra.mxu1 %v3055_v9 }
 0x18b   :  { %775 = vmatprep.subr.mxu0 %v2924_v37  ;;  %2285 = vmatprep.subr.mxu1 %v3739_v18 }
 0x18c   :  { %776 = vmatpush1.msra.mxu0 %v2928_v38  ;;  %2286 = vmatpush3.msra.mxu1 %v3059_v11 }
 0x18d   :  { %777 = vmatprep.subr.mxu0 %v2932_v39  ;;  %2287 = vmatprep.subr.mxu1 %v3739_v18 }
 0x18e   :  { %778 = vmatpush1.msra.mxu0 %v2937_v40  ;;  %2288 = vmatpush3.msra.mxu1 %v3063_v13 }
 0x18f   :  { %779 = vmatprep.subr.mxu0 %v2942_v42  ;;  %2289 = vmatprep.subr.mxu1 %v3739_v18 }
 0x190   :  { %780 = vmatpush1.msra.mxu0 %v3740_v25  ;;  %2290 = vmatpush3.msra.mxu1 %v3741_v32 }
 0x191   :  { %781 = vmatprep.subr.mxu0 %v3742_v41  ;;  %2291 = vmatprep.subr.mxu1 %v3739_v18  ;;  %v739_v41 = vrot.slane %v569_v49, 2 }
 0x192   :  { %782 = vmatpush1.msra.mxu0 %v3743_v36  ;;  %815 = vmatprep.mubr.f32.mxu0 %v3739_v18 }
 0x193   :  { %2292 = vmatpush3.msra.mxu1 %v3744_v48  ;;  %2293 = vmatprep.mubr.msk.f32.mxu1 %vm2744_vm2, %v3739_v18 }
 0x194   :  { %932 = vmatprep.subr.mxu0 %v3745_v45  ;;  %2296 = vmatprep.subr.mxu1 %v3739_v18 }
 0x233   :  { %v636_v47 = vpop.f32.mrf.mxu0  ;;  %v707_v4 = vpop.f32.mrf.mxu1 }
 0x234   :  { %v736_v45 = vadd.f32 %v707_v4, %v3122_v0 }
 0x235   :  { %v638_v27 = vpop.f32.mrf.mxu0  ;;  %v2260_v44 = vpop.f32.mrf.mxu1 }
 0x236   :  { %v713_v14 = vcombine.low %v636_v47, %v638_v27 }
 0x238   :  { %v720_v46 = vrot.slane %v713_v14, %v3115_v16 }
 0x23a   :  { %v727_v20 = vrot.slane %v720_v46, %v3115_v16 }
 0x23c   :  { %v729_v50 = vadd.f32 %v727_v20, %v569_v49 }
 0x23e   :  { %v1999_v51 = vmul.f32 -1.442695, %v729_v50 }
 0x240   :  { %2525 = vpow2.f32 %v1999_v51 }
 0x24d   :  { %v2526_v43 = vpop.eup %2525 }
 0x24e   :  { %v733_v52 = vadd.f32 1.0, %v2526_v43 }
 0x250   :  { %2527 = vrcp.f32 %v733_v52 }
 0x25d   :  { %v2528_v48 = vpop.eup %2527 }
 0x25e   :  { %v737_v36 = vmul.f32 %v2528_v48, %v736_v45  ;;  %v745_v27 = vrot.slane %v2528_v48, 1  ;;  %v750_v45 = vld [vmem:[#allocation3 + $0x2] ss:$8 sm:$0x7] }
 0x260   :  { %v741_v32 = vadd.f32 %v739_v41, %v737_v36 }
 0x262   :  { %2529 = vtanh.f32 %v741_v32 }
 0x26f   :  { %v2530_v44 = vpop.eup %2529 }
 0x270   :  { %v743_v47 = vsub.f32 %v3125_v53, %v2530_v44 }
 0x272   :  { %v747_v14 = vmul.f32 %v745_v27, %v743_v47 }
 0x274   :  { %v3200_v46 = vadd.f32 %v2530_v44, %v747_v14  ;;  %v920_v44 = vrot.slane %v750_v45, 2 }
 0x276   :  { %816 = vmatmul.mubr.f32.vlgmr.msra.gmra.mxu0 %v3200_v46  ;;  %2294 = vmatmul.mubr.f32.vlgmr.msra.gmra.mxu1 %v3200_v46 }
 0x277   :  { %933 = vmatpush1.msra.mxu0 %v2815_v1  ;;  %2297 = vmatpush3.msra.mxu1 %v2998_v54  ;;  %v3746_v1 = vld [vmem:[#allocation24_spill] sm:$0xff] }
 0x278   :  { %934 = vmatprep.subr.mxu0 %v2817_v2  ;;  %2298 = vmatprep.subr.mxu1 %v3739_v18  ;;  %v3747_v2 = vld [vmem:[#allocation22_spill] sm:$0xff] }
 0x279   :  { %935 = vmatpush1.msra.mxu0 %v2822_v3  ;;  %2299 = vmatpush3.msra.mxu1 %v3004_v55  ;;  %v3748_v3 = vld [vmem:[#allocation23_spill] sm:$0xff] }
 0x27a   :  { %936 = vmatprep.subr.mxu0 %v2828_v5  ;;  %2300 = vmatprep.subr.mxu1 %v3739_v18  ;;  %v3749_v5 = vld [vmem:[#allocation25_spill] sm:$0xff] }
 0x27b   :  { %937 = vmatpush1.msra.mxu0 %v2834_v6  ;;  %2301 = vmatpush3.msra.mxu1 %v3010_v56  ;;  %v3750_v6 = vld [vmem:[#allocation20_spill] sm:$0xff] }
 0x27c   :  { %938 = vmatprep.subr.mxu0 %v2839_v7  ;;  %2302 = vmatprep.subr.mxu1 %v3739_v18 }
 0x27d   :  { %939 = vmatpush1.msra.mxu0 %v2844_v10  ;;  %2303 = vmatpush3.msra.mxu1 %v3016_v57 }
 0x27e   :  { %940 = vmatprep.subr.mxu0 %v2849_v12  ;;  %2304 = vmatprep.subr.mxu1 %v3739_v18 }
 0x27f   :  { %941 = vmatpush1.msra.mxu0 %v2854_v15  ;;  %2305 = vmatpush3.msra.mxu1 %v3022_v58 }
 0x280   :  { %942 = vmatprep.subr.mxu0 %v2859_v17  ;;  %2306 = vmatprep.subr.mxu1 %v3739_v18 }
 0x281   :  { %943 = vmatpush1.msra.mxu0 %v2863_v19  ;;  %2307 = vmatpush3.msra.mxu1 %v3028_v59 }
 0x282   :  { %944 = vmatprep.subr.mxu0 %v2867_v21  ;;  %2308 = vmatprep.subr.mxu1 %v3739_v18 }
 0x283   :  { %945 = vmatpush1.msra.mxu0 %v2872_v22  ;;  %2309 = vmatpush3.msra.mxu1 %v3034_v60 }
 0x284   :  { %946 = vmatprep.subr.mxu0 %v2877_v23  ;;  %2310 = vmatprep.subr.mxu1 %v3739_v18 }
 0x285   :  { %947 = vmatpush1.msra.mxu0 %v2881_v24  ;;  %2311 = vmatpush3.msra.mxu1 %v3039_v61 }
 0x286   :  { %948 = vmatprep.subr.mxu0 %v2886_v26  ;;  %2312 = vmatprep.subr.mxu1 %v3739_v18 }
 0x287   :  { %949 = vmatpush1.msra.mxu0 %v2891_v28  ;;  %2313 = vmatpush3.msra.mxu1 %v3043_v62 }
 0x288   :  { %950 = vmatprep.subr.mxu0 %v2897_v29  ;;  %2314 = vmatprep.subr.mxu1 %v3739_v18 }
 0x289   :  { %951 = vmatpush1.msra.mxu0 %v2902_v30  ;;  %2315 = vmatpush3.msra.mxu1 %v3047_v63 }
 0x28a   :  { %952 = vmatprep.subr.mxu0 %v2906_v31  ;;  %2316 = vmatprep.subr.mxu1 %v3739_v18 }
 0x28b   :  { %953 = vmatpush1.msra.mxu0 %v2910_v33  ;;  %2317 = vmatpush3.msra.mxu1 %v3051_v8 }
 0x28c   :  { %954 = vmatprep.subr.mxu0 %v2915_v34  ;;  %2318 = vmatprep.subr.mxu1 %v3739_v18 }
 0x28d   :  { %955 = vmatpush1.msra.mxu0 %v2919_v35  ;;  %2319 = vmatpush3.msra.mxu1 %v3055_v9 }
 0x28e   :  { %956 = vmatprep.subr.mxu0 %v2924_v37  ;;  %2320 = vmatprep.subr.mxu1 %v3739_v18 }
 0x28f   :  { %957 = vmatpush1.msra.mxu0 %v2928_v38  ;;  %2321 = vmatpush3.msra.mxu1 %v3059_v11 }
 0x290   :  { %958 = vmatprep.subr.mxu0 %v2932_v39  ;;  %2322 = vmatprep.subr.mxu1 %v3739_v18 }
 0x291   :  { %959 = vmatpush1.msra.mxu0 %v2937_v40  ;;  %2323 = vmatpush3.msra.mxu1 %v3063_v13 }
 0x292   :  { %960 = vmatprep.subr.mxu0 %v2942_v42  ;;  %2324 = vmatprep.subr.mxu1 %v3739_v18 }
 0x293   :  { %961 = vmatpush1.msra.mxu0 %v3740_v25  ;;  %2325 = vmatpush3.msra.mxu1 %v3746_v1 }
 0x294   :  { %962 = vmatprep.subr.mxu0 %v3747_v2  ;;  %2326 = vmatprep.subr.mxu1 %v3739_v18 }
 0x295   :  { %963 = vmatpush1.msra.mxu0 %v3748_v3  ;;  %996 = vmatprep.mubr.f32.mxu0 %v3739_v18 }
 0x296   :  { %2327 = vmatpush3.msra.mxu1 %v3749_v5  ;;  %2328 = vmatprep.mubr.msk.f32.mxu1 %vm2744_vm2, %v3739_v18 }
 0x297   :  { %1113 = vmatprep.subr.mxu0 %v3750_v6  ;;  %2331 = vmatprep.subr.mxu1 %v3739_v18 }
 0x336   :  { %v817_v7 = vpop.f32.mrf.mxu0  ;;  %v888_v10 = vpop.f32.mrf.mxu1 }
 0x337   :  { %v917_v51 = vadd.f32 %v888_v10, %v3122_v0  ;;  %v3283_v10 = vld [vmem:[#allocation11 + $0x158] sm:$0xff] }
 0x338   :  { %v819_v53 = vpop.f32.mrf.mxu0  ;;  %v2295_v32 = vpop.f32.mrf.mxu1 }
 0x339   :  { %v894_v41 = vcombine.low %v817_v7, %v819_v53  ;;  %v3279_v32 = vld [vmem:[#allocation11 + $0x168] sm:$0xff] }
 0x33b   :  { %v901_v36 = vrot.slane %v894_v41, %v3115_v16  ;;  %v3291_v41 = vld [vmem:[#allocation11 + $0x140] sm:$0xff] }
 0x33d   :  { %v908_v48 = vrot.slane %v901_v36, %v3115_v16  ;;  %v3295_v36 = vld [vmem:[#allocation11 + $0x138] sm:$0xff] }
 0x33f   :  { %v910_v4 = vadd.f32 %v908_v48, %v750_v45  ;;  %v3299_v48 = vld [vmem:[#allocation11 + $0x128] sm:$0xff]  ;;  %v3303_v45 = vld [vmem:[#allocation11 + $0x120] sm:$0xff] }
 0x341   :  { %v2000_v20 = vmul.f32 -1.442695, %v910_v4  ;;  %v3404_v4 = vld [vmem:[#allocation11 + $0xd8] sm:$0xff] }
 0x343   :  { %2531 = vpow2.f32 %v2000_v20  ;;  %v3412_v20 = vld [vmem:[#allocation11 + $0xc0] sm:$0xff] }
 0x350   :  { %v2532_v49 = vpop.eup %2531 }
 0x351   :  { %v914_v50 = vadd.f32 1.0, %v2532_v49  ;;  %v3420_v49 = vld [vmem:[#allocation11 + $0xa8] sm:$0xff] }
 0x353   :  { %2533 = vrcp.f32 %v914_v50  ;;  %v3428_v50 = vld [vmem:[#allocation11 + $0x90] sm:$0xff] }
 0x360   :  { %v2534_v43 = vpop.eup %2533 }
 0x361   :  { %v918_v52 = vmul.f32 %v2534_v43, %v917_v51  ;;  %v926_v6 = vrot.slane %v2534_v43, 1  ;;  %v3436_v51 = vld [vmem:[#allocation11 + $0x78] sm:$0xff]  ;;  %v3444_v43 = vld [vmem:[#allocation11 + $0x60] sm:$0xff] }
 0x363   :  { %v922_v47 = vadd.f32 %v920_v44, %v918_v52  ;;  %v3452_v52 = vld [vmem:[#allocation11 + $0x48] sm:$0xff]  ;;  %v3460_v44 = vld [vmem:[#allocation11 + $0x30] sm:$0xff] }
 0x365   :  { %2535 = vtanh.f32 %v922_v47  ;;  %v3468_v47 = vld [vmem:[#allocation11 + $0x18] sm:$0xff] }
 0x372   :  { %v2536_v27 = vpop.eup %2535 }
 0x373   :  { %v924_v14 = vsub.f32 %v3200_v46, %v2536_v27  ;;  %v3287_v46 = vld [vmem:[#allocation11 + $0x150] sm:$0xff] }
 0x375   :  { %v928_v7 = vmul.f32 %v926_v6, %v924_v14 }
 0x377   :  { %v3275_v53 = vadd.f32 %v2536_v27, %v928_v7  ;;  %v3476_v27 = vld [vmem:[#allocation11] sm:$0xff] }
 0x378   :  { %3752 = vst [vmem:[#allocation24_spill] sm:$0xff] %v3476_v27 }
 0x379   :  { %997 = vmatmul.mubr.f32.vlgmr.msra.gmra.mxu0 %v3275_v53  ;;  %2329 = vmatmul.mubr.f32.vlgmr.msra.gmra.mxu1 %v3275_v53 }
 0x37a   :  { %1114 = vmatpush1.msra.mxu0 %v3279_v32  ;;  %2332 = vmatpush3.msra.mxu1 %v2998_v54 }
 0x37b   :  { %1115 = vmatprep.subr.mxu0 %v3283_v10  ;;  %2333 = vmatprep.subr.mxu1 %v3739_v18 }
 0x37c   :  { %1116 = vmatpush1.msra.mxu0 %v3287_v46  ;;  %2334 = vmatpush3.msra.mxu1 %v3004_v55 }
 0x37d   :  { %1117 = vmatprep.subr.mxu0 %v3291_v41  ;;  %2335 = vmatprep.subr.mxu1 %v3739_v18 }
 0x37e   :  { %1118 = vmatpush1.msra.mxu0 %v3295_v36  ;;  %2336 = vmatpush3.msra.mxu1 %v3010_v56 }
 0x37f   :  { %1119 = vmatprep.subr.mxu0 %v3299_v48  ;;  %2337 = vmatprep.subr.mxu1 %v3739_v18 }
 0x380   :  { %1120 = vmatpush1.msra.mxu0 %v3303_v45  ;;  %2338 = vmatpush3.msra.mxu1 %v3016_v57 }
 0x381   :  { %1121 = vmatprep.subr.mxu0 %v2849_v12  ;;  %2339 = vmatprep.subr.mxu1 %v3739_v18  ;;  %v3358_v12 = vld [vmem:[#allocation11 + $0x170] sm:$0xff] }
 0x382   :  { %1122 = vmatpush1.msra.mxu0 %v2854_v15  ;;  %2340 = vmatpush3.msra.mxu1 %v3022_v58 }
 0x383   :  { %1123 = vmatprep.subr.mxu0 %v2859_v17  ;;  %2341 = vmatprep.subr.mxu1 %v3739_v18 }
 0x384   :  { %1124 = vmatpush1.msra.mxu0 %v2863_v19  ;;  %2342 = vmatpush3.msra.mxu1 %v3028_v59 }
 0x385   :  { %1125 = vmatprep.subr.mxu0 %v2867_v21  ;;  %2343 = vmatprep.subr.mxu1 %v3739_v18 }
 0x386   :  { %1126 = vmatpush1.msra.mxu0 %v2872_v22  ;;  %2344 = vmatpush3.msra.mxu1 %v3034_v60 }
 0x387   :  { %1127 = vmatprep.subr.mxu0 %v2877_v23  ;;  %2345 = vmatprep.subr.mxu1 %v3739_v18 }
 0x388   :  { %1128 = vmatpush1.msra.mxu0 %v2881_v24  ;;  %2346 = vmatpush3.msra.mxu1 %v3039_v61 }
 0x389   :  { %1129 = vmatprep.subr.mxu0 %v2886_v26  ;;  %2347 = vmatprep.subr.mxu1 %v3739_v18  ;;  %v931_v26 = vld [vmem:[#allocation3 + $0x3] ss:$8 sm:$0x7] }
 0x38a   :  { %1130 = vmatpush1.msra.mxu0 %v2891_v28  ;;  %2348 = vmatpush3.msra.mxu1 %v3043_v62 }
 0x38b   :  { %1131 = vmatprep.subr.mxu0 %v2897_v29  ;;  %2349 = vmatprep.subr.mxu1 %v3739_v18 }
 0x38c   :  { %1132 = vmatpush1.msra.mxu0 %v2902_v30  ;;  %2350 = vmatpush3.msra.mxu1 %v3047_v63 }
 0x38d   :  { %1133 = vmatprep.subr.mxu0 %v2906_v31  ;;  %2351 = vmatprep.subr.mxu1 %v3739_v18 }
 0x38e   :  { %1134 = vmatpush1.msra.mxu0 %v2910_v33  ;;  %2352 = vmatpush3.msra.mxu1 %v3051_v8 }
 0x38f   :  { %1135 = vmatprep.subr.mxu0 %v2915_v34  ;;  %2353 = vmatprep.subr.mxu1 %v3739_v18 }
 0x390   :  { %1136 = vmatpush1.msra.mxu0 %v2919_v35  ;;  %2354 = vmatpush3.msra.mxu1 %v3055_v9 }
 0x391   :  { %1137 = vmatprep.subr.mxu0 %v2924_v37  ;;  %2355 = vmatprep.subr.mxu1 %v3739_v18  ;;  %v1101_v37 = vrot.slane %v931_v26, 2 }
 0x392   :  { %1138 = vmatpush1.msra.mxu0 %v2928_v38  ;;  %2356 = vmatpush3.msra.mxu1 %v3059_v11 }
 0x393   :  { %1139 = vmatprep.subr.mxu0 %v2932_v39  ;;  %2357 = vmatprep.subr.mxu1 %v3739_v18 }
 0x394   :  { %1140 = vmatpush1.msra.mxu0 %v2937_v40  ;;  %2358 = vmatpush3.msra.mxu1 %v3063_v13 }
 0x395   :  { %1141 = vmatprep.subr.mxu0 %v2942_v42  ;;  %2359 = vmatprep.subr.mxu1 %v3739_v18 }
 0x396   :  { %1142 = vmatpush1.msra.mxu0 %v3740_v25  ;;  %2360 = vmatpush3.msra.mxu1 %v3746_v1 }
 0x397   :  { %1143 = vmatprep.subr.mxu0 %v3747_v2  ;;  %2361 = vmatprep.subr.mxu1 %v3739_v18 }
 0x398   :  { %1144 = vmatpush1.msra.mxu0 %v3748_v3  ;;  %1177 = vmatprep.mubr.f32.mxu0 %v3739_v18  ;;  %v3396_v3 = vld [vmem:[#allocation11 + $0xf0] sm:$0xff] }
 0x399   :  { %2362 = vmatpush3.msra.mxu1 %v3749_v5  ;;  %2363 = vmatprep.mubr.msk.f32.mxu1 %vm2744_vm2, %v3739_v18 }
 0x39a   :  { %1294 = vmatprep.subr.mxu0 %v3358_v12  ;;  %2366 = vmatprep.subr.mxu1 %v3739_v18 }
 0x439   :  { %v998_v15 = vpop.f32.mrf.mxu0  ;;  %v1069_v17 = vpop.f32.mrf.mxu1 }
 0x43a   :  { %v1098_v33 = vadd.f32 %v1069_v17, %v3122_v0  ;;  %v1112_v17 = vld [vmem:[#allocation3 + $0x4] ss:$8 sm:$0x7] }
 0x43b   :  { %v1000_v19 = vpop.f32.mrf.mxu0  ;;  %v2330_v21 = vpop.f32.mrf.mxu1 }
 0x43c   :  { %v1075_v22 = vcombine.low %v998_v15, %v1000_v19 }
 0x43e   :  { %v1082_v23 = vrot.slane %v1075_v22, %v3115_v16 }
 0x440   :  { %v1089_v24 = vrot.slane %v1082_v23, %v3115_v16 }
 0x442   :  { %v1091_v28 = vadd.f32 %v1089_v24, %v931_v26 }
 0x444   :  { %v2001_v29 = vmul.f32 -1.442695, %v1091_v28  ;;  %v1282_v28 = vrot.slane %v1112_v17, 2 }
 0x446   :  { %2537 = vpow2.f32 %v2001_v29 }
 0x453   :  { %v2538_v30 = vpop.eup %2537 }
 0x454   :  { %v1095_v31 = vadd.f32 1.0, %v2538_v30 }
 0x456   :  { %2539 = vrcp.f32 %v1095_v31 }
 0x463   :  { %v2540_v34 = vpop.eup %2539 }
 0x464   :  { %v1099_v35 = vmul.f32 %v2540_v34, %v1098_v33  ;;  %v1107_v42 = vrot.slane %v2540_v34, 1 }
 0x466   :  { %v1103_v38 = vadd.f32 %v1101_v37, %v1099_v35  ;;  %v3494_v37 = vld [vmem:[#allocation11 + $0x178] sm:$0xff] }
 0x468   :  { %2541 = vtanh.f32 %v1103_v38  ;;  %v3500_v38 = vld [vmem:[#allocation11 + $0x160] sm:$0xff] }
 0x475   :  { %v2542_v39 = vpop.eup %2541 }
 0x476   :  { %v1105_v40 = vsub.f32 %v3275_v53, %v2542_v39 }
 0x478   :  { %v1109_v25 = vmul.f32 %v1107_v42, %v1105_v40  ;;  %v3512_v40 = vld [vmem:[#allocation11 + $0x130] sm:$0xff]  ;;  %v3518_v42 = vld [vmem:[#allocation11 + $0x118] sm:$0xff] }
 0x47a   :  { %v3366_v2 = vadd.f32 %v2542_v39, %v1109_v25  ;;  %v3506_v39 = vld [vmem:[#allocation11 + $0x148] sm:$0xff]  ;;  %v3524_v25 = vld [vmem:[#allocation11 + $0x100] sm:$0xff] }
 0x47c   :  { %1178 = vmatmul.mubr.f32.vlgmr.msra.gmra.mxu0 %v3366_v2  ;;  %2364 = vmatmul.mubr.f32.vlgmr.msra.gmra.mxu1 %v3366_v2 }
 0x47d   :  { %1295 = vmatpush1.msra.mxu0 %v3279_v32  ;;  %2367 = vmatpush3.msra.mxu1 %v2998_v54  ;;  %v3384_v54 = vld [vmem:[#allocation11 + $0x110] sm:$0xff] }
 0x47e   :  { %1296 = vmatprep.subr.mxu0 %v3283_v10  ;;  %2368 = vmatprep.subr.mxu1 %v3739_v18 }
 0x47f   :  { %1297 = vmatpush1.msra.mxu0 %v3287_v46  ;;  %2369 = vmatpush3.msra.mxu1 %v3004_v55  ;;  %v3388_v55 = vld [vmem:[#allocation11 + $0x108] sm:$0xff] }
 0x480   :  { %1298 = vmatprep.subr.mxu0 %v3291_v41  ;;  %2370 = vmatprep.subr.mxu1 %v3739_v18 }
 0x481   :  { %1299 = vmatpush1.msra.mxu0 %v3295_v36  ;;  %2371 = vmatpush3.msra.mxu1 %v3010_v56  ;;  %v3392_v56 = vld [vmem:[#allocation11 + $0xf8] sm:$0xff] }
 0x482   :  { %1300 = vmatprep.subr.mxu0 %v3299_v48  ;;  %2372 = vmatprep.subr.mxu1 %v3739_v18 }
 0x483   :  { %1301 = vmatpush1.msra.mxu0 %v3303_v45  ;;  %2373 = vmatpush3.msra.mxu1 %v3016_v57  ;;  %v3400_v57 = vld [vmem:[#allocation11 + $0xe0] sm:$0xff] }
 0x484   :  { %1302 = vmatprep.subr.mxu0 %v3384_v54  ;;  %2374 = vmatprep.subr.mxu1 %v3739_v18 }
 0x485   :  { %1303 = vmatpush1.msra.mxu0 %v3388_v55  ;;  %2375 = vmatpush3.msra.mxu1 %v3022_v58  ;;  %v3408_v58 = vld [vmem:[#allocation11 + $0xc8] sm:$0xff] }
 0x486   :  { %1304 = vmatprep.subr.mxu0 %v3392_v56  ;;  %2376 = vmatprep.subr.mxu1 %v3739_v18 }
 0x487   :  { %1305 = vmatpush1.msra.mxu0 %v3396_v3  ;;  %2377 = vmatpush3.msra.mxu1 %v3028_v59  ;;  %v3416_v59 = vld [vmem:[#allocation11 + $0xb0] sm:$0xff] }
 0x488   :  { %1306 = vmatprep.subr.mxu0 %v3400_v57  ;;  %2378 = vmatprep.subr.mxu1 %v3739_v18 }
 0x489   :  { %1307 = vmatpush1.msra.mxu0 %v3404_v4  ;;  %2379 = vmatpush3.msra.mxu1 %v3034_v60  ;;  %v3424_v60 = vld [vmem:[#allocation11 + $0x98] sm:$0xff] }
 0x48a   :  { %1308 = vmatprep.subr.mxu0 %v3408_v58  ;;  %2380 = vmatprep.subr.mxu1 %v3739_v18 }
 0x48b   :  { %1309 = vmatpush1.msra.mxu0 %v3412_v20  ;;  %2381 = vmatpush3.msra.mxu1 %v3039_v61  ;;  %v3432_v61 = vld [vmem:[#allocation11 + $0x80] sm:$0xff] }
 0x48c   :  { %1310 = vmatprep.subr.mxu0 %v3416_v59  ;;  %2382 = vmatprep.subr.mxu1 %v3739_v18 }
 0x48d   :  { %1311 = vmatpush1.msra.mxu0 %v3420_v49  ;;  %2383 = vmatpush3.msra.mxu1 %v3043_v62  ;;  %v3440_v62 = vld [vmem:[#allocation11 + $0x68] sm:$0xff] }
 0x48e   :  { %1312 = vmatprep.subr.mxu0 %v3424_v60  ;;  %2384 = vmatprep.subr.mxu1 %v3739_v18 }
 0x48f   :  { %1313 = vmatpush1.msra.mxu0 %v3428_v50  ;;  %2385 = vmatpush3.msra.mxu1 %v3047_v63  ;;  %v3448_v63 = vld [vmem:[#allocation11 + $0x50] sm:$0xff] }
 0x490   :  { %1314 = vmatprep.subr.mxu0 %v3432_v61  ;;  %2386 = vmatprep.subr.mxu1 %v3739_v18 }
 0x491   :  { %1315 = vmatpush1.msra.mxu0 %v3436_v51  ;;  %2387 = vmatpush3.msra.mxu1 %v3051_v8  ;;  %v3456_v8 = vld [vmem:[#allocation11 + $0x38] sm:$0xff] }
 0x492   :  { %1316 = vmatprep.subr.mxu0 %v3440_v62  ;;  %2388 = vmatprep.subr.mxu1 %v3739_v18 }
 0x493   :  { %1317 = vmatpush1.msra.mxu0 %v3444_v43  ;;  %2389 = vmatpush3.msra.mxu1 %v3055_v9  ;;  %v3464_v9 = vld [vmem:[#allocation11 + $0x20] sm:$0xff] }
 0x494   :  { %1318 = vmatprep.subr.mxu0 %v3448_v63  ;;  %2390 = vmatprep.subr.mxu1 %v3739_v18 }
 0x495   :  { %1319 = vmatpush1.msra.mxu0 %v3452_v52  ;;  %2391 = vmatpush3.msra.mxu1 %v3059_v11  ;;  %v3472_v11 = vld [vmem:[#allocation11 + $0x8] sm:$0xff] }
 0x496   :  { %1320 = vmatprep.subr.mxu0 %v3456_v8  ;;  %2392 = vmatprep.subr.mxu1 %v3739_v18  ;;  %3751 = vst [vmem:[#allocation21_spill] sm:$0xff] %v3472_v11 }
 0x497   :  { %1321 = vmatpush1.msra.mxu0 %v3460_v44  ;;  %2393 = vmatpush3.msra.mxu1 %v3063_v13 }
 0x498   :  { %1322 = vmatprep.subr.mxu0 %v3464_v9  ;;  %2394 = vmatprep.subr.mxu1 %v3739_v18 }
 0x499   :  { %1323 = vmatpush1.msra.mxu0 %v3468_v47  ;;  %2395 = vmatpush3.msra.mxu1 %v3746_v1 }
 0x49a   :  { %1324 = vmatprep.subr.mxu0 %v3472_v11  ;;  %2396 = vmatprep.subr.mxu1 %v3739_v18 }
 0x49b   :  { %1325 = vmatpush1.msra.mxu0 %v3476_v27  ;;  %1358 = vmatprep.mubr.f32.mxu0 %v3739_v18 }
 0x49c   :  { %2397 = vmatpush3.msra.mxu1 %v3749_v5  ;;  %2398 = vmatprep.mubr.msk.f32.mxu1 %vm2744_vm2, %v3739_v18 }
 0x49d   :  { %1475 = vmatprep.subr.mxu0 %v3358_v12  ;;  %2401 = vmatprep.subr.mxu1 %v3739_v18 }
 0x53c   :  { %v1179_v13 = vpop.f32.mrf.mxu0  ;;  %v1250_v1 = vpop.f32.mrf.mxu1 }
 0x53d   :  { %v1279_v23 = vadd.f32 %v1250_v1, %v3122_v0  ;;  %v3542_v1 = vld [vmem:[#allocation11 + $0xb8] sm:$0xff] }
 0x53e   :  { %v1181_v14 = vpop.f32.mrf.mxu0  ;;  %v2365_v6 = vpop.f32.mrf.mxu1 }
 0x53f   :  { %v1256_v7 = vcombine.low %v1179_v13, %v1181_v14  ;;  %v3536_v13 = vld [vmem:[#allocation11 + $0xd0] sm:$0xff]  ;;  %v3548_v14 = vld [vmem:[#allocation11 + $0xa0] sm:$0xff]  ;;  %v3554_v6 = vld [vmem:[#allocation11 + $0x88] sm:$0xff] }
 0x541   :  { %v1263_v53 = vrot.slane %v1256_v7, %v3115_v16  ;;  %v3560_v7 = vld [vmem:[#allocation11 + $0x70] sm:$0xff] }
 0x543   :  { %v1270_v15 = vrot.slane %v1263_v53, %v3115_v16  ;;  %v3566_v53 = vld [vmem:[#allocation11 + $0x58] sm:$0xff] }
 0x545   :  { %v1272_v19 = vadd.f32 %v1270_v15, %v1112_v17  ;;  %v3572_v15 = vld [vmem:[#allocation11 + $0x40] sm:$0xff]  ;;  %v3578_v17 = vld [vmem:[#allocation11 + $0x28] sm:$0xff] }
 0x546   :  { %3753 = vst [vmem:[#allocation22_spill] sm:$0xff] %v3578_v17 }
 0x547   :  { %v2002_v21 = vmul.f32 -1.442695, %v1272_v19  ;;  %v3585_v19 = vld [vmem:[#allocation11 + $0x10] sm:$0xff] }
 0x548   :  { %3754 = vst [vmem:[#allocation23_spill] sm:$0xff] %v3585_v19 }
 0x549   :  { %2543 = vpow2.f32 %v2002_v21 }
 0x556   :  { %v2544_v5 = vpop.eup %2543 }
 0x557   :  { %v1276_v22 = vadd.f32 1.0, %v2544_v5 }
 0x559   :  { %2545 = vrcp.f32 %v1276_v22 }
 0x566   :  { %v2546_v24 = vpop.eup %2545 }
 0x567   :  { %v1280_v26 = vmul.f32 %v2546_v24, %v1279_v23  ;;  %v1288_v33 = vrot.slane %v2546_v24, 1 }
 0x569   :  { %v1284_v29 = vadd.f32 %v1282_v28, %v1280_v26 }
 0x56b   :  { %2547 = vtanh.f32 %v1284_v29  ;;  %v1293_v29 = vld [vmem:[#allocation3 + $0x5] ss:$8 sm:$0x7] }
 0x578   :  { %v2548_v30 = vpop.eup %2547 }
 0x579   :  { %v1286_v31 = vsub.f32 %v3366_v2, %v2548_v30  ;;  %v3530_v2 = vld [vmem:[#allocation11 + $0xe8] sm:$0xff] }
 0x57b   :  { %v1290_v34 = vmul.f32 %v1288_v33, %v1286_v31 }
 0x57d   :  { %v3489_v35 = vadd.f32 %v2548_v30, %v1290_v34 }
 0x57f   :  { %1359 = vmatmul.mubr.f32.vlgmr.msra.gmra.mxu0 %v3489_v35  ;;  %2399 = vmatmul.mubr.f32.vlgmr.msra.gmra.mxu1 %v3489_v35 }
 0x580   :  { %1476 = vmatpush1.msra.mxu0 %v3279_v32  ;;  %2402 = vmatpush3.msra.mxu1 %v3494_v37 }
 0x581   :  { %1477 = vmatprep.subr.mxu0 %v3283_v10  ;;  %2403 = vmatprep.subr.mxu1 %v3739_v18 }
 0x582   :  { %1478 = vmatpush1.msra.mxu0 %v3287_v46  ;;  %2404 = vmatpush3.msra.mxu1 %v3500_v38 }
 0x583   :  { %1479 = vmatprep.subr.mxu0 %v3291_v41  ;;  %2405 = vmatprep.subr.mxu1 %v3739_v18 }
 0x584   :  { %1480 = vmatpush1.msra.mxu0 %v3295_v36  ;;  %2406 = vmatpush3.msra.mxu1 %v3506_v39 }
 0x585   :  { %1481 = vmatprep.subr.mxu0 %v3299_v48  ;;  %2407 = vmatprep.subr.mxu1 %v3739_v18 }
 0x586   :  { %1482 = vmatpush1.msra.mxu0 %v3303_v45  ;;  %2408 = vmatpush3.msra.mxu1 %v3512_v40 }
 0x587   :  { %1483 = vmatprep.subr.mxu0 %v3384_v54  ;;  %2409 = vmatprep.subr.mxu1 %v3739_v18 }
 0x588   :  { %1484 = vmatpush1.msra.mxu0 %v3388_v55  ;;  %2410 = vmatpush3.msra.mxu1 %v3518_v42 }
 0x589   :  { %1485 = vmatprep.subr.mxu0 %v3392_v56  ;;  %2411 = vmatprep.subr.mxu1 %v3739_v18 }
 0x58a   :  { %1486 = vmatpush1.msra.mxu0 %v3396_v3  ;;  %2412 = vmatpush3.msra.mxu1 %v3524_v25 }
 0x58b   :  { %1487 = vmatprep.subr.mxu0 %v3400_v57  ;;  %2413 = vmatprep.subr.mxu1 %v3739_v18 }
 0x58c   :  { %1488 = vmatpush1.msra.mxu0 %v3404_v4  ;;  %2414 = vmatpush3.msra.mxu1 %v3530_v2 }
 0x58d   :  { %1489 = vmatprep.subr.mxu0 %v3408_v58  ;;  %2415 = vmatprep.subr.mxu1 %v3739_v18 }
 0x58e   :  { %1490 = vmatpush1.msra.mxu0 %v3412_v20  ;;  %2416 = vmatpush3.msra.mxu1 %v3536_v13 }
 0x58f   :  { %1491 = vmatprep.subr.mxu0 %v3416_v59  ;;  %2417 = vmatprep.subr.mxu1 %v3739_v18 }
 0x590   :  { %1492 = vmatpush1.msra.mxu0 %v3420_v49  ;;  %2418 = vmatpush3.msra.mxu1 %v3542_v1 }
 0x591   :  { %1493 = vmatprep.subr.mxu0 %v3424_v60  ;;  %2419 = vmatprep.subr.mxu1 %v3739_v18 }
 0x592   :  { %1494 = vmatpush1.msra.mxu0 %v3428_v50  ;;  %2420 = vmatpush3.msra.mxu1 %v3548_v14 }
 0x593   :  { %1495 = vmatprep.subr.mxu0 %v3432_v61  ;;  %2421 = vmatprep.subr.mxu1 %v3739_v18 }
 0x594   :  { %1496 = vmatpush1.msra.mxu0 %v3436_v51  ;;  %2422 = vmatpush3.msra.mxu1 %v3554_v6 }
 0x595   :  { %1497 = vmatprep.subr.mxu0 %v3440_v62  ;;  %2423 = vmatprep.subr.mxu1 %v3739_v18 }
 0x596   :  { %1498 = vmatpush1.msra.mxu0 %v3444_v43  ;;  %2424 = vmatpush3.msra.mxu1 %v3560_v7 }
 0x597   :  { %1499 = vmatprep.subr.mxu0 %v3448_v63  ;;  %2425 = vmatprep.subr.mxu1 %v3739_v18 }
 0x598   :  { %1500 = vmatpush1.msra.mxu0 %v3452_v52  ;;  %2426 = vmatpush3.msra.mxu1 %v3566_v53 }
 0x599   :  { %1501 = vmatprep.subr.mxu0 %v3456_v8  ;;  %2427 = vmatprep.subr.mxu1 %v3739_v18 }
 0x59a   :  { %1502 = vmatpush1.msra.mxu0 %v3460_v44  ;;  %2428 = vmatpush3.msra.mxu1 %v3572_v15 }
 0x59b   :  { %1503 = vmatprep.subr.mxu0 %v3464_v9  ;;  %2429 = vmatprep.subr.mxu1 %v3739_v18 }
 0x59c   :  { %1504 = vmatpush1.msra.mxu0 %v3468_v47  ;;  %2430 = vmatpush3.msra.mxu1 %v3578_v17 }
 0x59d   :  { %1505 = vmatprep.subr.mxu0 %v3472_v11  ;;  %2431 = vmatprep.subr.mxu1 %v3739_v18  ;;  %v1463_v11 = vrot.slane %v1293_v29, 2 }
 0x59e   :  { %1506 = vmatpush1.msra.mxu0 %v3476_v27  ;;  %1539 = vmatprep.mubr.f32.mxu0 %v3739_v18 }
 0x59f   :  { %2432 = vmatpush3.msra.mxu1 %v3585_v19  ;;  %2433 = vmatprep.mubr.msk.f32.mxu1 %vm2744_vm2, %v3739_v18 }
 0x5a0   :  { %1656 = vmatprep.subr.mxu0 %v3358_v12  ;;  %2436 = vmatprep.subr.mxu1 %v3739_v18 }
 0x63f   :  { %v1360_v21 = vpop.f32.mrf.mxu0  ;;  %v1431_v5 = vpop.f32.mrf.mxu1 }
 0x640   :  { %v1460_v12 = vadd.f32 %v1431_v5, %v3122_v0  ;;  %v3755_v0 = vld [vmem:[#allocation22_spill] sm:$0xff] }
 0x641   :  { %v1362_v22 = vpop.f32.mrf.mxu0  ;;  %v2400_v23 = vpop.f32.mrf.mxu1 }
 0x642   :  { %v1437_v24 = vcombine.low %v1360_v21, %v1362_v22 }
 0x644   :  { %v1444_v26 = vrot.slane %v1437_v24, %v3115_v16 }
 0x646   :  { %v1451_v28 = vrot.slane %v1444_v26, %v3115_v16 }
 0x648   :  { %v1453_v30 = vadd.f32 %v1451_v28, %v1293_v29  ;;  %v1655_v28 = vld [vmem:[#allocation3 + $0x7] ss:$8 sm:$0x7] }
 0x64a   :  { %v2003_v31 = vmul.f32 -1.442695, %v1453_v30 }
 0x64c   :  { %2549 = vpow2.f32 %v2003_v31 }
 0x659   :  { %v2550_v33 = vpop.eup %2549 }
 0x65a   :  { %v1457_v34 = vadd.f32 1.0, %v2550_v33 }
 0x65c   :  { %2551 = vrcp.f32 %v1457_v34 }
 0x669   :  { %v2552_v19 = vpop.eup %2551 }
 0x66a   :  { %v1461_v27 = vmul.f32 %v2552_v19, %v1460_v12  ;;  %v1469_v22 = vrot.slane %v2552_v19, 1 }
 0x66c   :  { %v1465_v17 = vadd.f32 %v1463_v11, %v1461_v27  ;;  %v1847_v11 = vld [vmem:[#allocation12 + $0x60] sm:$0xff]  ;;  %v1846_v27 = vld [vmem:[#allocation12 + $0x58] sm:$0xff] }
 0x66e   :  { %2553 = vtanh.f32 %v1465_v17 }
 0x67b   :  { %v2554_v23 = vpop.eup %2553 }
 0x67c   :  { %v1467_v21 = vsub.f32 %v3489_v35, %v2554_v23  ;;  %v1845_v35 = vld [vmem:[#allocation12 + $0x50] sm:$0xff] }
 0x67e   :  { %v1471_v24 = vmul.f32 %v1469_v22, %v1467_v21 }
 0x680   :  { %v3596_v26 = vadd.f32 %v2554_v23, %v1471_v24  ;;  %v1825_v23 = vrot.slane %v1655_v28, 2 }
 0x682   :  { %1540 = vmatmul.mubr.f32.vlgmr.msra.gmra.mxu0 %v3596_v26  ;;  %2434 = vmatmul.mubr.f32.vlgmr.msra.gmra.mxu1 %v3596_v26 }
 0x683   :  { %1657 = vmatpush1.msra.mxu0 %v3279_v32  ;;  %2437 = vmatpush3.msra.mxu1 %v3494_v37  ;;  %v3756_v32 = vld [vmem:[#allocation21_spill] sm:$0xff] }
 0x684   :  { %1658 = vmatprep.subr.mxu0 %v3283_v10  ;;  %2438 = vmatprep.subr.mxu1 %v3739_v18  ;;  %v3757_v10 = vld [vmem:[#allocation24_spill] sm:$0xff] }
 0x685   :  { %1659 = vmatpush1.msra.mxu0 %v3287_v46  ;;  %2439 = vmatpush3.msra.mxu1 %v3500_v38  ;;  %v3758_v46 = vld [vmem:[#allocation23_spill] sm:$0xff]  ;;  %v1844_v37 = vld [vmem:[#allocation12 + $0x48] sm:$0xff] }
 0x686   :  { %1660 = vmatprep.subr.mxu0 %v3291_v41  ;;  %2440 = vmatprep.subr.mxu1 %v3739_v18  ;;  %v1843_v38 = vld [vmem:[#allocation12 + $0x40] sm:$0xff] }
 0x687   :  { %1661 = vmatpush1.msra.mxu0 %v3295_v36  ;;  %2441 = vmatpush3.msra.mxu1 %v3506_v39  ;;  %v1842_v39 = vld [vmem:[#allocation12 + $0x38] sm:$0xff] }
 0x688   :  { %1662 = vmatprep.subr.mxu0 %v3299_v48  ;;  %2442 = vmatprep.subr.mxu1 %v3739_v18 }
 0x689   :  { %1663 = vmatpush1.msra.mxu0 %v3303_v45  ;;  %2443 = vmatpush3.msra.mxu1 %v3512_v40  ;;  %v1841_v40 = vld [vmem:[#allocation12 + $0x30] sm:$0xff] }
 0x68a   :  { %1664 = vmatprep.subr.mxu0 %v3384_v54  ;;  %2444 = vmatprep.subr.mxu1 %v3739_v18 }
 0x68b   :  { %1665 = vmatpush1.msra.mxu0 %v3388_v55  ;;  %2445 = vmatpush3.msra.mxu1 %v3518_v42  ;;  %v1840_v42 = vld [vmem:[#allocation12 + $0x28] sm:$0xff] }
 0x68c   :  { %1666 = vmatprep.subr.mxu0 %v3392_v56  ;;  %2446 = vmatprep.subr.mxu1 %v3739_v18 }
 0x68d   :  { %1667 = vmatpush1.msra.mxu0 %v3396_v3  ;;  %2447 = vmatpush3.msra.mxu1 %v3524_v25  ;;  %v1474_v3 = vld [vmem:[#allocation3 + $0x6] ss:$8 sm:$0x7]  ;;  %v1839_v25 = vld [vmem:[#allocation12 + $0x20] sm:$0xff] }
 0x68e   :  { %1668 = vmatprep.subr.mxu0 %v3400_v57  ;;  %2448 = vmatprep.subr.mxu1 %v3739_v18 }
 0x68f   :  { %1669 = vmatpush1.msra.mxu0 %v3404_v4  ;;  %2449 = vmatpush3.msra.mxu1 %v3530_v2  ;;  %v1838_v2 = vld [vmem:[#allocation12 + $0x18] sm:$0xff] }
 0x690   :  { %1670 = vmatprep.subr.mxu0 %v3408_v58  ;;  %2450 = vmatprep.subr.mxu1 %v3739_v18 }
 0x691   :  { %1671 = vmatpush1.msra.mxu0 %v3412_v20  ;;  %2451 = vmatpush3.msra.mxu1 %v3536_v13  ;;  %v1837_v13 = vld [vmem:[#allocation12 + $0x10] sm:$0xff] }
 0x692   :  { %1672 = vmatprep.subr.mxu0 %v3416_v59  ;;  %2452 = vmatprep.subr.mxu1 %v3739_v18  ;;  %v3671_v59 = vld [vmem:[%s3711_s5] sm:$0x1] }
 0x693   :  { %1673 = vmatpush1.msra.mxu0 %v3420_v49  ;;  %2453 = vmatpush3.msra.mxu1 %v3542_v1  ;;  %v1836_v1 = vld [vmem:[#allocation12 + $0x8] sm:$0xff] }
 0x694   :  { %1674 = vmatprep.subr.mxu0 %v3424_v60  ;;  %2454 = vmatprep.subr.mxu1 %v3739_v18 }
 0x695   :  { %1675 = vmatpush1.msra.mxu0 %v3428_v50  ;;  %2455 = vmatpush3.msra.mxu1 %v3548_v14  ;;  %v1835_v14 = vld [vmem:[#allocation12] sm:$0xff] }
 0x696   :  { %1676 = vmatprep.subr.mxu0 %v3432_v61  ;;  %2456 = vmatprep.subr.mxu1 %v3739_v18  ;;  %v1644_v61 = vrot.slane %v1474_v3, 2 }
 0x697   :  { %1677 = vmatpush1.msra.mxu0 %v3436_v51  ;;  %2457 = vmatpush3.msra.mxu1 %v3554_v6 }
 0x698   :  { %1678 = vmatprep.subr.mxu0 %v3440_v62  ;;  %2458 = vmatprep.subr.mxu1 %v3739_v18 }
 0x699   :  { %1679 = vmatpush1.msra.mxu0 %v3444_v43  ;;  %2459 = vmatpush3.msra.mxu1 %v3560_v7 }
 0x69a   :  { %1680 = vmatprep.subr.mxu0 %v3448_v63  ;;  %2460 = vmatprep.subr.mxu1 %v3739_v18 }
 0x69b   :  { %1681 = vmatpush1.msra.mxu0 %v3452_v52  ;;  %2461 = vmatpush3.msra.mxu1 %v3566_v53 }
 0x69c   :  { %1682 = vmatprep.subr.mxu0 %v3456_v8  ;;  %2462 = vmatprep.subr.mxu1 %v3739_v18 }
 0x69d   :  { %1683 = vmatpush1.msra.mxu0 %v3460_v44  ;;  %2463 = vmatpush3.msra.mxu1 %v3572_v15  ;;  %v1850_v44 = vld [vmem:[#allocation12 + $0x78] sm:$0xff] }
 0x69e   :  { %1684 = vmatprep.subr.mxu0 %v3464_v9  ;;  %2464 = vmatprep.subr.mxu1 %v3739_v18  ;;  %v1849_v9 = vld [vmem:[#allocation12 + $0x70] sm:$0xff] }
 0x69f   :  { %1685 = vmatpush1.msra.mxu0 %v3468_v47  ;;  %2465 = vmatpush3.msra.mxu1 %v3755_v0  ;;  %v1848_v47 = vld [vmem:[#allocation12 + $0x68] sm:$0xff] }
 0x6a0   :  { %1686 = vmatprep.subr.mxu0 %v3756_v32  ;;  %2466 = vmatprep.subr.mxu1 %v3739_v18  ;;  %v1851_v32 = vld [vmem:[%s3713_s7] sm:$0x1] }
 0x6a1   :  { %1687 = vmatpush1.msra.mxu0 %v3757_v10  ;;  %1720 = vmatprep.mubr.f32.mxu0 %v3739_v18 }
 0x6a2   :  { %2467 = vmatpush3.msra.mxu1 %v3758_v46  ;;  %2468 = vmatprep.mubr.msk.f32.mxu1 %vm2744_vm2, %v3739_v18 }
 0x6a3   :  { %2471 = vmatprep.subr.mxu0 %v3739_v18 }
 0x742   :  { %v1541_v41 = vpop.f32.mrf.mxu0  ;;  %v1612_v36 = vpop.f32.mrf.mxu1 }
 0x743   :  { %v1641_v49 = vadd.f32 %v3671_v59, %v1612_v36 }
 0x744   :  { %v1543_v48 = vpop.f32.mrf.mxu0  ;;  %v2435_v45 = vpop.f32.mrf.mxu1 }
 0x745   :  { %v1618_v54 = vcombine.low %v1541_v41, %v1543_v48 }
 0x747   :  { %v1625_v55 = vrot.slane %v1618_v54, %v3115_v16 }
 0x749   :  { %v1632_v56 = vrot.slane %v1625_v55, %v3115_v16 }
 0x74b   :  { %v1634_v57 = vadd.f32 %v1632_v56, %v1474_v3 }
 0x74d   :  { %v2004_v4 = vmul.f32 -1.442695, %v1634_v57 }
 0x74f   :  { %2555 = vpow2.f32 %v2004_v4 }
 0x75c   :  { %v2556_v58 = vpop.eup %2555 }
 0x75d   :  { %v1638_v20 = vadd.f32 1.0, %v2556_v58 }
 0x75f   :  { %2557 = vrcp.f32 %v1638_v20 }
 0x76c   :  { %v2558_v60 = vpop.eup %2557 }
 0x76d   :  { %v1642_v50 = vmul.f32 %v2558_v60, %v1641_v49  ;;  %v1650_v63 = vrot.slane %v2558_v60, 1 }
 0x76f   :  { %v1646_v51 = vadd.f32 %v1644_v61, %v1642_v50 }
 0x771   :  { %2559 = vtanh.f32 %v1646_v51 }
 0x77e   :  { %v2560_v62 = vpop.eup %2559 }
 0x77f   :  { %v1648_v43 = vsub.f32 %v3596_v26, %v2560_v62 }
 0x781   :  { %v1652_v52 = vmul.f32 %v1650_v63, %v1648_v43 }
 0x783   :  { %v3675_v8 = vadd.f32 %v2560_v62, %v1652_v52 }
 0x785   :  { %1721 = vmatmul.mubr.f32.vlgmr.msra.gmra.mxu0 %v3675_v8  ;;  %2469 = vmatmul.mubr.f32.vlgmr.msra.gmra.mxu1 %v3675_v8 }
 0x786   :  { %2503 = vmatprep.mubr.msk.f32.mxu0 %vm2744_vm2, %v3739_v18  ;;  %2472 = vmatpush3.msra.mxu0 %v1850_v44 }
 0x787   :  { %2473 = vmatprep.subr.mxu0 %v3739_v18 }
 0x788   :  { %2474 = vmatpush3.msra.mxu0 %v1849_v9 }
 0x789   :  { %2475 = vmatprep.subr.mxu0 %v3739_v18 }
 0x78a   :  { %2476 = vmatpush3.msra.mxu0 %v1848_v47 }
 0x78b   :  { %2477 = vmatprep.subr.mxu0 %v3739_v18 }
 0x78c   :  { %2478 = vmatpush3.msra.mxu0 %v1847_v11 }
 0x78d   :  { %2479 = vmatprep.subr.mxu0 %v3739_v18 }
 0x78e   :  { %2480 = vmatpush3.msra.mxu0 %v1846_v27 }
 0x78f   :  { %2481 = vmatprep.subr.mxu0 %v3739_v18 }
 0x790   :  { %2482 = vmatpush3.msra.mxu0 %v1845_v35 }
 0x791   :  { %2483 = vmatprep.subr.mxu0 %v3739_v18 }
 0x792   :  { %2484 = vmatpush3.msra.mxu0 %v1844_v37 }
 0x793   :  { %2485 = vmatprep.subr.mxu0 %v3739_v18 }
 0x794   :  { %2486 = vmatpush3.msra.mxu0 %v1843_v38 }
 0x795   :  { %2487 = vmatprep.subr.mxu0 %v3739_v18 }
 0x796   :  { %2488 = vmatpush3.msra.mxu0 %v1842_v39 }
 0x797   :  { %2489 = vmatprep.subr.mxu0 %v3739_v18 }
 0x798   :  { %2490 = vmatpush3.msra.mxu0 %v1841_v40 }
 0x799   :  { %2491 = vmatprep.subr.mxu0 %v3739_v18 }
 0x79a   :  { %2492 = vmatpush3.msra.mxu0 %v1840_v42 }
 0x79b   :  { %2493 = vmatprep.subr.mxu0 %v3739_v18 }
 0x79c   :  { %2494 = vmatpush3.msra.mxu0 %v1839_v25 }
 0x79d   :  { %2495 = vmatprep.subr.mxu0 %v3739_v18 }
 0x79e   :  { %2496 = vmatpush3.msra.mxu0 %v1838_v2 }
 0x79f   :  { %2497 = vmatprep.subr.mxu0 %v3739_v18 }
 0x7a0   :  { %2498 = vmatpush3.msra.mxu0 %v1837_v13 }
 0x7a1   :  { %2499 = vmatprep.subr.mxu0 %v3739_v18 }
 0x7a2   :  { %2500 = vmatpush3.msra.mxu0 %v1836_v1 }
 0x7a3   :  { %2501 = vmatprep.subr.mxu0 %v3739_v18 }
 0x7a4   :  { %2502 = vmatpush3.msra.mxu0 %v1835_v14 }
 0x845   :  { %v1722_v6 = vpop.f32.mrf.mxu0  ;;  %v1793_v7 = vpop.f32.mrf.mxu1 }
 0x846   :  { %v1822_v34 = vadd.f32 %v3671_v59, %v1793_v7 }
 0x847   :  { %v1724_v53 = vpop.f32.mrf.mxu0  ;;  %v2470_v15 = vpop.f32.mrf.mxu1 }
 0x848   :  { %v1799_v17 = vcombine.low %v1722_v6, %v1724_v53 }
 0x84a   :  { %v1806_v19 = vrot.slane %v1799_v17, %v3115_v16 }
 0x84c   :  { %v1813_v5 = vrot.slane %v1806_v19, %v3115_v16 }
 0x84e   :  { %v1815_v29 = vadd.f32 %v1813_v5, %v1655_v28 }
 0x850   :  { %v2005_v30 = vmul.f32 -1.442695, %v1815_v29 }
 0x852   :  { %2561 = vpow2.f32 %v2005_v30 }
 0x85f   :  { %v2562_v31 = vpop.eup %2561 }
 0x860   :  { %v1819_v33 = vadd.f32 1.0, %v2562_v31 }
 0x862   :  { %2563 = vrcp.f32 %v1819_v33 }
 0x86f   :  { %v2564_v18 = vpop.eup %2563 }
 0x870   :  { %v1823_v12 = vmul.f32 %v2564_v18, %v1822_v34  ;;  %v1831_v26 = vrot.slane %v2564_v18, 1 }
 0x872   :  { %v1827_v21 = vadd.f32 %v1825_v23, %v1823_v12 }
 0x874   :  { %2565 = vtanh.f32 %v1827_v21 }
 0x881   :  { %v2566_v22 = vpop.eup %2565 }
 0x882   :  { %v1829_v24 = vsub.f32 %v3675_v8, %v2566_v22 }
 0x884   :  { %v1833_v0 = vmul.f32 %v1831_v26, %v1829_v24 }
 0x886   :  { %v1834_v16 = vadd.f32 %v2566_v22, %v1833_v0 }
 0x888   :  { %2504 = vmatmul.mubr.f32.vlgmr.msra.gmra.mxu0 %v1834_v16 }
 0x948   :  { %v1918_v10 = vpop.f32.mrf.mxu0 }
 0x949   :  { %v1919_v46 = vadd.f32 %v1918_v10, %v1851_v32 }
 0x94a   :  { %v2505_v41 = vpop.f32.mrf.mxu0 }
 0x94b   :  { %1922 = vst [vmem:[#allocation14] sm:$0x1] %v1919_v46 }
 0x94c   :  { %2715 = shalt.err (!%p2712_p12)
}
 0x94d   :  { %1932 = dma.vmem_to_hbm [thread:$0]  %s1930_s6, 16, %s3714_s8, [#allocation6]  }
 0x94e   :  { %2732 = dma.done.wait [#allocation6], 16  }
 0x94f   :  { %2733 = vsyncadd [#allocation6], 4294967280 }
 0x950   :  { %1936 = vsyncpa [#allocation5], 1 }
 0x951   :  { %1937 = vsyncpa [#allocation10], 1 }
 0x952   :  { %1938 = vsyncpa [#allocation13], 1 }
 0x953   :  { %1939 = vsyncpa [#allocation6], 1 }
 0x954   :  { %1940 = vsyncpa [#allocation7], 1 }

</bundles_post_ra>
